<compile_context>
chip_gen: v6e
topology: v6e:2x2x1
jax: 0.10.0
libtpu: 0.0.40
codegen_flags: <defaults>
</compile_context>

<pallas_src>
import functools

import jax
import jax.numpy as jnp
from jax import lax
from jax.experimental import pallas as pl
from jax.experimental.pallas import tpu as pltpu
import numpy as np

# ----------------------------- model config ---------------------------------
IMG_SHAPE = (1, 256, 65)                 # as in the PyTorch source
NOISE_DIM = 100
NUM_CLASSES = 30
HIDDEN = 256
OUT_DIM = int(np.prod(IMG_SHAPE))        # 16640 = 130 * 128  (lane friendly)

# padded sizes used only for layout (zero padding does not change the math)
NOISE_DIM_P = 128                        # lane-pad 100 -> 128
NUM_CLASSES_P = 32                       # sublane-pad 30 -> 32


# ------------------------------- kernel --------------------------------------
def _generator_kernel(noise_ref, lab_ref, emb_ref, w1_ref, b1_ref,
                      w2q_ref, s2_ref, b2_ref, out_ref):
    """Fused generator forward for one W2 column tile.

    Layer 1 is recomputed per grid step (tiny; hidden under the W2 tile DMA).
    """
    bp = noise_ref.shape[0]
    ncp = emb_ref.shape[0]

    # ---- embedding gather (one-hot MXU gather, no dynamic indexing) ----------
    onehot = (lab_ref[...] ==
              lax.broadcasted_iota(jnp.int32, (bp, ncp), 1)).astype(jnp.float32)
    emb_rows = jnp.dot(onehot, emb_ref[...],
                       preferred_element_type=jnp.float32)          # (bp, 128)

    # ---- layer 1: gen_input = noise * emb ; h = ReLU(gen @ W1 + b1) ----------
    gen = noise_ref[...] * emb_rows
    h = jnp.dot(gen, w1_ref[...], preferred_element_type=jnp.float32) + b1_ref[...]
    h = jnp.maximum(h, 0.0).astype(jnp.bfloat16)                     # (bp, 256)

    # ---- layer 2 tile: int8 W2 -> bf16 (exact), f32 acc, scale, bias, tanh ---
    w2 = w2q_ref[...].astype(jnp.float32).astype(jnp.bfloat16)       # exact widen
    acc = jnp.dot(h, w2, preferred_element_type=jnp.float32)         # (bp, tn) f32
    out_ref[...] = jnp.tanh(acc * s2_ref[...] + b2_ref[...])
    # TODO(synk): emit bf16 output (halves writeback + v7x out-buffer pressure) if
    # downstream consumers tolerate it; kept f32 to match the module semantics.


# ------------------------------- wrapper -------------------------------------
@functools.partial(jax.jit, static_argnames=("tn",))
def generator_forward(noise, labels, params, *, tn=3328):
    """noise: (B, NOISE_DIM) f32, labels: (B,) int -> (B, 1, 256, 65) f32.

    `params` must come from prepare_params (int8 W2 + scales, padded emb/W1).
    """
    emb_p, w1_p, b1_2d = params["emb_p"], params["w1_p"], params["b1"]
    w2q, w2_scale, b2_2d = params["w2q"], params["w2_scale"], params["b2"]

    # Enforce the param-prep contract; no hidden per-call casts.
    assert w2q.dtype == jnp.int8, "run prepare_params() first (W2 must be int8)"
    assert emb_p.shape == (NUM_CLASSES_P, NOISE_DIM_P)
    assert w1_p.shape == (NOISE_DIM_P, HIDDEN)
    assert OUT_DIM % tn == 0 and tn % 128 == 0

    B = noise.shape[0]
    Bp = -(-B // 8) * 8                   # pad rows to a sublane multiple
    # TODO(synk): for large B add a batch grid axis (bm=128, "parallel") instead of a
    # single (Bp, tn) out block, to stay inside v7x's 64 MiB VMEM.
    pad = Bp - B

    # Tiny (<= few KB) layout pads; all heavy work happens inside the kernel.
    noise_p = jnp.pad(noise.astype(jnp.float32),
                      ((0, pad), (0, NOISE_DIM_P - NOISE_DIM)))
    labels_p = jnp.pad(labels.astype(jnp.int32), ((0, pad),)).reshape(Bp, 1)

    grid = (OUT_DIM // tn,)

    out_flat = pl.pallas_call(
        _generator_kernel,
        out_shape=jax.ShapeDtypeStruct((Bp, OUT_DIM), jnp.float32),
        grid_spec=pltpu.PrefetchScalarGridSpec(
            num_scalar_prefetch=0,
            grid=grid,
            in_specs=[
                pl.BlockSpec((Bp, NOISE_DIM_P), lambda j: (0, 0)),     # noise (invariant)
                pl.BlockSpec((Bp, 1), lambda j: (0, 0)),               # labels (invariant)
                pl.BlockSpec((NUM_CLASSES_P, NOISE_DIM_P), lambda j: (0, 0)),  # emb table
                pl.BlockSpec((NOISE_DIM_P, HIDDEN), lambda j: (0, 0)), # W1 (invariant)
                pl.BlockSpec((1, HIDDEN), lambda j: (0, 0)),           # b1 (invariant)
                pl.BlockSpec((HIDDEN, tn), lambda j: (0, j)),          # W2 tile (int8)
                pl.BlockSpec((1, tn), lambda j: (0, j)),               # W2 column scales
                pl.BlockSpec((1, tn), lambda j: (0, j)),               # b2 tile
            ],
            out_specs=pl.BlockSpec((Bp, tn), lambda j: (0, j)),
        ),
        compiler_params=pltpu.CompilerParams(
            dimension_semantics=("parallel",),
        ),
    )(noise_p, labels_p, emb_p, w1_p, b1_2d, w2q, w2_scale, b2_2d)

    return out_flat[:B].reshape(B, *IMG_SHAPE)


# --------------------------- deterministic params ----------------------------
def init_params(key):
    k_emb, k_w1, k_b1, k_w2, k_b2 = jax.random.split(key, 5)
    # nn.Embedding default: N(0, 1)
    emb = jax.random.normal(k_emb, (NUM_CLASSES, NOISE_DIM), jnp.float32)
    # nn.Linear default: U(-1/sqrt(fan_in), 1/sqrt(fan_in))
    lim1 = 1.0 / np.sqrt(NOISE_DIM)
    w1 = jax.random.uniform(k_w1, (NOISE_DIM, HIDDEN), jnp.float32, -lim1, lim1)
    b1 = jax.random.uniform(k_b1, (HIDDEN,), jnp.float32, -lim1, lim1)
    lim2 = 1.0 / np.sqrt(HIDDEN)
    w2 = jax.random.uniform(k_w2, (HIDDEN, OUT_DIM), jnp.float32, -lim2, lim2)
    b2 = jax.random.uniform(k_b2, (OUT_DIM,), jnp.float32, -lim2, lim2)
    return {"emb": emb, "w1": w1, "b1": b1, "w2": w2, "b2": b2}


def prepare_params(params_f32):
    """One-time param prep (NOT per forward call):
      * pad emb table / W1 to lane/sublane-aligned shapes (zero pad, exact math),
      * quantize W2 to int8 with per-output-column f32 scales (halves the dominant
        HBM weight stream vs bf16; safe on v5e/v6e/v7x).
    """
    emb, w1, b1 = params_f32["emb"], params_f32["w1"], params_f32["b1"]
    w2, b2 = params_f32["w2"], params_f32["b2"]

    emb_p = jnp.pad(emb, ((0, NUM_CLASSES_P - NUM_CLASSES),
                          (0, NOISE_DIM_P - NOISE_DIM)))
    w1_p = jnp.pad(w1, ((0, NOISE_DIM_P - NOISE_DIM), (0, 0)))

    scale = jnp.maximum(jnp.max(jnp.abs(w2), axis=0) / 127.0, 1e-12)   # (OUT_DIM,)
    w2q = jnp.clip(jnp.round(w2 / scale), -127, 127).astype(jnp.int8)

    return {
        "emb_p": emb_p,
        "w1_p": w1_p,
        "b1": b1.reshape(1, HIDDEN),
        "w2q": w2q,
        "w2_scale": scale.reshape(1, OUT_DIM).astype(jnp.float32),
        "b2": b2.reshape(1, OUT_DIM),
    }
    # TODO(synk): on v7x, fp8 e4m3 W2 (native MXU input) is an alternative to the
    # int8+scale widen path; kept one int8 recipe so a single code path covers all gens.


# ------------------------------- references ----------------------------------
def _reference_f32(noise, labels, params_f32):
    gen = noise * params_f32["emb"][labels]
    h = jnp.maximum(gen @ params_f32["w1"] + params_f32["b1"], 0.0)
    out = jnp.tanh(h @ params_f32["w2"] + params_f32["b2"])
    return out.reshape(noise.shape[0], *IMG_SHAPE)


def _reference_quant(noise, labels, params_f32, qparams):
    # Mirrors the kernel's numerics: bf16 h, int8 W2 (exact in bf16), f32 accumulate,
    # per-column scale applied on the accumulator.
    gen = noise * params_f32["emb"][labels]
    h = jnp.maximum(gen @ params_f32["w1"] + params_f32["b1"], 0.0)
    h = h.astype(jnp.bfloat16).astype(jnp.float32)
    acc = h @ qparams["w2q"].astype(jnp.float32)
    out = jnp.tanh(acc * qparams["w2_scale"] + qparams["b2"])
    return out.reshape(noise.shape[0], *IMG_SHAPE)


if __name__ == "__main__":
    key = jax.random.PRNGKey(0)
    k_p, k_noise, k_lab = jax.random.split(key, 3)

    B = 2
    params_f32 = init_params(k_p)
    params = prepare_params(params_f32)
    noise = jax.random.normal(k_noise, (B, NOISE_DIM), jnp.float32)
    labels = jax.random.randint(k_lab, (B,), 0, NUM_CLASSES, jnp.int32)

    out = generator_forward(noise, labels, params)
    out = jax.block_until_ready(out)
    assert out.shape == (B, *IMG_SHAPE), out.shape

    # Tight check against a reference using the same quantization choices.
    ref_q = _reference_quant(noise, labels, params_f32, params)
    np.testing.assert_allclose(np.asarray(out), np.asarray(ref_q), rtol=2e-3, atol=2e-3)

    # Looser check against the original full-f32 module semantics (int8 W2 + bf16 h).
    ref_f32 = _reference_f32(noise, labels, params_f32)
    np.testing.assert_allclose(np.asarray(out), np.asarray(ref_f32), rtol=3e-2, atol=3e-2)

    print("KERNEL_OK")
</pallas_src>

<mosaic_0001>
module attributes {stable_mosaic.version = 11 : i64} {
  func.func @_generator_kernel(%arg0: i32, %arg1: memref<8x128xf32, #tpu.memory_space<vmem>>, %arg2: memref<8x1xi32, #tpu.memory_space<vmem>>, %arg3: memref<32x128xf32, #tpu.memory_space<vmem>>, %arg4: memref<128x256xf32, #tpu.memory_space<vmem>>, %arg5: memref<1x256xf32, #tpu.memory_space<vmem>>, %arg6: memref<256x3328xi8, #tpu.memory_space<vmem>>, %arg7: memref<1x3328xf32, #tpu.memory_space<vmem>>, %arg8: memref<1x3328xf32, #tpu.memory_space<vmem>>, %arg9: memref<8x3328xf32, #tpu.memory_space<vmem>>) attributes {dimension_semantics = [#tpu.dimension_semantics<parallel>], iteration_bounds = array<i64: 5>, scalar_prefetch = 0 : i64, scratch_operands = 0 : i64, tpu.core_type = #tpu.core_type<tc>, window_params = [{pipeline_mode = #tpu.pipeline_mode<synchronous>, transform_indices = @transform_0, window_bounds = array<i64: 8, 128>}, {pipeline_mode = #tpu.pipeline_mode<synchronous>, transform_indices = @transform_1, window_bounds = array<i64: 8, 1>}, {pipeline_mode = #tpu.pipeline_mode<synchronous>, transform_indices = @transform_2, window_bounds = array<i64: 32, 128>}, {pipeline_mode = #tpu.pipeline_mode<synchronous>, transform_indices = @transform_3, window_bounds = array<i64: 128, 256>}, {pipeline_mode = #tpu.pipeline_mode<synchronous>, transform_indices = @transform_4, window_bounds = array<i64: 1, 256>}, {transform_indices = @transform_5, window_bounds = array<i64: 256, 3328>}, {transform_indices = @transform_6, window_bounds = array<i64: 1, 3328>}, {transform_indices = @transform_7, window_bounds = array<i64: 1, 3328>}, {transform_indices = @transform_8, window_bounds = array<i64: 8, 3328>}]} {
    %c0 = arith.constant 0 : index
    %c0_0 = arith.constant 0 : index
    %0 = vector.load %arg2[%c0, %c0_0] : memref<8x1xi32, #tpu.memory_space<vmem>>, vector<8x1xi32>
    %1 = tpu.iota {dimensions = array<i32: 1>} : vector<8x32xi32>
    %2 = vector.broadcast %0 : vector<8x1xi32> to vector<8x32xi32>
    %3 = arith.cmpi eq, %2, %1 : vector<8x32xi32>
    %4 = arith.extui %3 : vector<8x32xi1> to vector<8x32xi32>
    %5 = arith.sitofp %4 : vector<8x32xi32> to vector<8x32xf32>
    %c0_1 = arith.constant 0 : index
    %c0_2 = arith.constant 0 : index
    %6 = vector.load %arg3[%c0_1, %c0_2] : memref<32x128xf32, #tpu.memory_space<vmem>>, vector<32x128xf32>
    %cst = arith.constant dense<0.000000e+00> : vector<8x128xf32>
    %7 = tpu.matmul %5, %6, %cst {dimension_numbers = #tpu.dot_dimension_numbers<[1], [0], [0], [1], [0, 0, 1, 1], [], []>} : vector<8x32xf32>, vector<32x128xf32>, vector<8x128xf32> -> vector<8x128xf32>
    %c0_3 = arith.constant 0 : index
    %c0_4 = arith.constant 0 : index
    %8 = vector.load %arg1[%c0_3, %c0_4] : memref<8x128xf32, #tpu.memory_space<vmem>>, vector<8x128xf32>
    %9 = arith.mulf %8, %7 : vector<8x128xf32>
    %c0_5 = arith.constant 0 : index
    %c0_6 = arith.constant 0 : index
    %10 = vector.load %arg4[%c0_5, %c0_6] : memref<128x256xf32, #tpu.memory_space<vmem>>, vector<128x256xf32>
    %cst_7 = arith.constant dense<0.000000e+00> : vector<8x256xf32>
    %11 = tpu.matmul %9, %10, %cst_7 {dimension_numbers = #tpu.dot_dimension_numbers<[1], [0], [0], [1], [0, 0, 1, 1], [], []>} : vector<8x128xf32>, vector<128x256xf32>, vector<8x256xf32> -> vector<8x256xf32>
    %c0_8 = arith.constant 0 : index
    %c0_9 = arith.constant 0 : index
    %12 = vector.load %arg5[%c0_8, %c0_9] : memref<1x256xf32, #tpu.memory_space<vmem>>, vector<1x256xf32>
    %13 = vector.broadcast %12 : vector<1x256xf32> to vector<8x256xf32>
    %14 = arith.addf %11, %13 : vector<8x256xf32>
    %cst_10 = arith.constant 0.000000e+00 : f32
    %15 = vector.broadcast %cst_10 : f32 to vector<8x256xf32>
    %16 = arith.maximumf %14, %15 : vector<8x256xf32>
    %17 = arith.truncf %16 : vector<8x256xf32> to vector<8x256xbf16>
    %c0_11 = arith.constant 0 : index
    %c0_12 = arith.constant 0 : index
    %18 = vector.load %arg6[%c0_11, %c0_12] : memref<256x3328xi8, #tpu.memory_space<vmem>>, vector<256x3328xi8>
    %19 = arith.sitofp %18 : vector<256x3328xi8> to vector<256x3328xf32>
    %20 = arith.truncf %19 : vector<256x3328xf32> to vector<256x3328xbf16>
    %cst_13 = arith.constant dense<0.000000e+00> : vector<8x3328xf32>
    %21 = tpu.matmul %17, %20, %cst_13 {dimension_numbers = #tpu.dot_dimension_numbers<[1], [0], [0], [1], [0, 0, 1, 1], [], []>} : vector<8x256xbf16>, vector<256x3328xbf16>, vector<8x3328xf32> -> vector<8x3328xf32>
    %c0_14 = arith.constant 0 : index
    %c0_15 = arith.constant 0 : index
    %22 = vector.load %arg7[%c0_14, %c0_15] : memref<1x3328xf32, #tpu.memory_space<vmem>>, vector<1x3328xf32>
    %23 = vector.broadcast %22 : vector<1x3328xf32> to vector<8x3328xf32>
    %24 = arith.mulf %21, %23 : vector<8x3328xf32>
    %c0_16 = arith.constant 0 : index
    %c0_17 = arith.constant 0 : index
    %25 = vector.load %arg8[%c0_16, %c0_17] : memref<1x3328xf32, #tpu.memory_space<vmem>>, vector<1x3328xf32>
    %26 = vector.broadcast %25 : vector<1x3328xf32> to vector<8x3328xf32>
    %27 = arith.addf %24, %26 : vector<8x3328xf32>
    %28 = math.tanh %27 : vector<8x3328xf32>
    %c0_18 = arith.constant 0 : index
    %c0_19 = arith.constant 0 : index
    %29 = vector.load %arg9[%c0_18, %c0_19] : memref<8x3328xf32, #tpu.memory_space<vmem>>, vector<8x3328xf32>
    tpu.vector_store %arg9[%c0_18, %c0_19], %28 {strides = array<i32>} : memref<8x3328xf32, #tpu.memory_space<vmem>>, vector<8x3328xf32>,
    return
  }
  func.func @transform_0(%arg0: i32) -> (i32, i32) {
    %c0_i32 = arith.constant 0 : i32
    %c0_i32_0 = arith.constant 0 : i32
    %c0_i32_1 = arith.constant 0 : i32
    return %c0_i32, %c0_i32_0 : i32, i32
  }
  func.func @transform_1(%arg0: i32) -> (i32, i32) {
    %c0_i32 = arith.constant 0 : i32
    %c0_i32_0 = arith.constant 0 : i32
    %c0_i32_1 = arith.constant 0 : i32
    return %c0_i32, %c0_i32_0 : i32, i32
  }
  func.func @transform_2(%arg0: i32) -> (i32, i32) {
    %c0_i32 = arith.constant 0 : i32
    %c0_i32_0 = arith.constant 0 : i32
    %c0_i32_1 = arith.constant 0 : i32
    return %c0_i32, %c0_i32_0 : i32, i32
  }
  func.func @transform_3(%arg0: i32) -> (i32, i32) {
    %c0_i32 = arith.constant 0 : i32
    %c0_i32_0 = arith.constant 0 : i32
    %c0_i32_1 = arith.constant 0 : i32
    return %c0_i32, %c0_i32_0 : i32, i32
  }
  func.func @transform_4(%arg0: i32) -> (i32, i32) {
    %c0_i32 = arith.constant 0 : i32
    %c0_i32_0 = arith.constant 0 : i32
    %c0_i32_1 = arith.constant 0 : i32
    return %c0_i32, %c0_i32_0 : i32, i32
  }
  func.func @transform_5(%arg0: i32) -> (i32, i32) {
    %c0_i32 = arith.constant 0 : i32
    %c0_i32_0 = arith.constant 0 : i32
    return %c0_i32, %arg0 : i32, i32
  }
  func.func @transform_6(%arg0: i32) -> (i32, i32) {
    %c0_i32 = arith.constant 0 : i32
    %c0_i32_0 = arith.constant 0 : i32
    return %c0_i32, %arg0 : i32, i32
  }
  func.func @transform_7(%arg0: i32) -> (i32, i32) {
    %c0_i32 = arith.constant 0 : i32
    %c0_i32_0 = arith.constant 0 : i32
    return %c0_i32, %arg0 : i32, i32
  }
  func.func @transform_8(%arg0: i32) -> (i32, i32) {
    %c0_i32 = arith.constant 0 : i32
    %c0_i32_0 = arith.constant 0 : i32
    return %c0_i32, %arg0 : i32, i32
  }
}

</mosaic_0001>

<bundles_post_ra>
// kernel: generator_forward.1
= control target key start
LH: loop header
LB: loop body
LE: loop exit
PB: predicated region body
PF: predicated region fallthrough
CT: control target
= control target key end

     0   :  { %s3429_s0 = inlined_call_operand.vmem [shape: f32[8,128], index: 0, kind: input, shape index: {}]   ;;  %s3430_s1 = inlined_call_operand.vmem [shape: s32[8,1], index: 1, kind: input, shape index: {}]   ;;  %s3431_s2 = inlined_call_operand.hbm [shape: f32[32,128], index: 2, kind: input, shape index: {}]   ;;  %s3432_s3 = inlined_call_operand.hbm [shape: f32[128,256], index: 3, kind: input, shape index: {}]   ;;  %s3433_s4 = inlined_call_operand.hbm [shape: f32[1,256], index: 4, kind: input, shape index: {}]   ;;  %s3434_s5 = inlined_call_operand.hbm [shape: s8[256,16640], index: 5, kind: input, shape index: {}]   ;;  %s3435_s6 = inlined_call_operand.hbm [shape: f32[1,16640], index: 6, kind: input, shape index: {}]   ;;  %s3436_s7 = inlined_call_operand.hbm [shape: f32[1,16640], index: 7, kind: input, shape index: {}]   ;;  %s3437_s8 = inlined_call_operand.vmem [shape: f32[8,16640], index: 8, kind: output, shape index: {}]  }
   0x1   :  { %3447 = sst [smem:[#allocation19_spill]] %s3437_s8 }
   0x2   :  { %13 = vsyncpa [#allocation3], 0 }
   0x3   :  { %14 = vsyncpa [#allocation5], 0 }
   0x4   :  { %15 = vsyncpa [#allocation8], 0 }
   0x5   :  { %17 = vsyncpa [#allocation8 + $0x1], 0 }
   0x6   :  { %18 = vsyncpa [#allocation11], 0 }
   0x7   :  { %20 = vsyncpa [#allocation11 + $0x1], 0  ;;  %s2788_s27 = smov 0   ;;  %s2790_s28 = smov 0  }
   0x8   :  { %s2792_s29 = smov 0   ;;  %s2794_s30 = smov 0  }
   0x9 LB: > { %3448 = sst [smem:[#allocation16_spill]] %s2721_s29  ;;  %s2807_s9 = sadd.s32 4294967295, %s2725_s30   ;;  %s2725_s30 = sphi %s2794_s30, %s3468_s30   ;;  %s2721_s29 = sphi %s2792_s29, %s3470_s29   ;;  %s2717_s28 = sphi %s2790_s28, %s3472_s28   ;;  %s2713_s27 = sphi %s2788_s27, %s3471_s27  }
   0xa   : > { %s2810_s10 = sadd.s32 1, %s2725_s30   ;;  %s138_s12 = sadd.s32 1, %s2721_s29 }
   0xb   : > { %3449 = sst [smem:[#allocation17_spill]] %s2810_s10  ;;  %s135_s11 = ssub.s32 %s2725_s30, %s2810_s10 }
   0xc   : > { %p136_p0 = scmp.eq.s32.totalorder %s135_s11, 0  ;;  %p145_p1 = scmp.ne.s32.totalorder %s2721_s29, %s2717_s28 }
   0xd   : > { %p146_p2 = scmp.eq.s32.totalorder %s2725_s30, 0  ;;  %p151_p3 = scmp.ne.s32.totalorder %s2717_s28, %s2713_s27 }
   0xe   : > { %s2820_s13 = scalar_select %p136_p0, %s2721_s29, %s138_s12  }
   0xf   : > { %p2822_p4 = por %p146_p2, %p145_p1  ;;  %p3438_p5 = scmp.eq.s32.totalorder %s2807_s9, 0 }
  0x10   : > { %3450 = sst [smem:[#allocation18_spill]] %s2820_s13  ;;  %p2333_p6 = scmp.ge.s32.totalorder %s2725_s30, 1 }
  0x11   : > { %p240_p7 = scmp.lt.s32.totalorder %s2725_s30, 6  ;;  %p2831_p8 = por %p3438_p5, %p151_p3 }
  0x12   : > { %s2727_s17 = smov [#allocation4]   ;;  %p2415_p12 = scmp.lt.s32.totalorder %s2725_s30, 5 }
  0x13   : > { %s3452_s15 = scalar_select %p2831_p8, 1, 0 }
  0x14   : > { %p2835_p9 = pnand %p2333_p6, %p240_p7  ;;  %s271_s18 = sshll.u32 %s2727_s17, 4  ;;  %s272_s18 = int_to_ptr.vmem [resolvable:$true] %s271_s18 }
  0x15   : > { %s296_s20 = sand.u32 1, %s2725_s30   ;;  %s2850_s21 = sand.u32 1, %s2721_s29  }
  0x16   : > { %s3453_s16 = scalar_select %p2835_p9, 1, 0 }
  0x17   : > { %p2392_p10 = pneg %p2835_p9  ;;  %p2854_p13 = pnand %p2415_p12, %p2822_p4 }
  0x18   : > { %s2528_s23 = scalar_lea.vmem %s272_s18, 4096  ;;  %p2536_p6 = scmp.lt.s32.totalorder %s272_s18, %s272_s18 }
  0x19   : > { %p2843_p11 = pnand %p2392_p10, %p3438_p5  ;;  %p2529_p1 = scmp.ne.s32.totalorder %s272_s18, %s2528_s23 }
  0x1a   : > { %p2537_p7 = scmp.lt.s32.totalorder %s2528_s23, %s2528_s23 }
  0x1b   : > { %s3454_s19 = scalar_select %p2843_p11, 1, 0 }
  0x1c   : > { %p3442_p0 = pneg %p2843_p11  ;;  %p2538_p10 = por %p2537_p7, %p2536_p6 }
  0x1e   : > { %p2531_p2 = pnand %p2529_p1, %p3442_p0 }
  0x20   : > { %p2532_p3 = pneg %p2531_p2 }
  0x22   : > { %p2539_p5 = pnand %p2538_p10, %p2532_p3 }
  0x24   : > { %2542 = shalt.err (!%p2539_p5)
}
  0x25   : > { %s2728_s24 = smov 256   ;;  %s2729_s25 = smov 16  }
  0x26   : > { %2398 = dma.hbm_to_vmem [thread:$0]  (!%p2843_p11), %s3432_s3, 4096, %s272_s18, [#allocation5], %s2728_s24, %s2728_s24, %s2729_s25  }
  0x27   : > { %s2369_s11 = smul.u32 1664, %s2850_s21  ;;  %s2877_s10 = scalar_lea.sflag [#allocation8], %s296_s20 }
  0x28   : > { %s2350_s12 = smul.u32 3328, %s2725_s30  ;;  %p2883_p5 = pneg %p2854_p13 }
  0x29   : > { %s300_s13 = scalar_lea.vmem [#allocation7], %s2369_s11  ;;  %s2548_s26 = scalar_lea.hbm %s3434_s5, 133120 }
  0x2a   : > { %s2873_s23 = scalar_lea.hbm %s3434_s5, %s2350_s12  ;;  %s307_s29 = sshll.u32 %s300_s13, 4  ;;  %s2875_s29 = int_to_ptr.vmem [resolvable:$true] %s307_s29 }
  0x2b   : > { %s2543_s8 = scalar_lea.hbm %s2873_s23, 26624  ;;  %p2549_p2 = scmp.lt.s32.totalorder %s2873_s23, %s3434_s5 }
  0x2c   : > { %p2544_p4 = scmp.ne.s32.totalorder %s2873_s23, %s2543_s8  ;;  %p2550_p3 = scmp.lt.s32.totalorder %s2548_s26, %s2543_s8 }
  0x2e   : > { %p2546_p12 = pnand %p2883_p5, %p2544_p4  ;;  %p2551_p6 = por %p2550_p3, %p2549_p2 }
  0x30   : > { %p2547_p1 = pneg %p2546_p12 }
  0x32   : > { %p2552_p7 = pnand %p2551_p6, %p2547_p1 }
  0x34   : > { %2555 = shalt.err (!%p2552_p7)
}
  0x35   : > { %s2556_s20 = scalar_lea.vmem %s2875_s29, 26624  ;;  %s2730_s11 = smov [#allocation7]  }
  0x36   : > { %p2557_p10 = scmp.ne.s32.totalorder %s2875_s29, %s2556_s20  ;;  %s2561_s12 = sshll.u32 %s2730_s11, 4  ;;  %s2562_s12 = int_to_ptr.vmem [resolvable:$false] %s2561_s12 }
  0x37   : > { %s2563_s14 = scalar_lea.vmem %s2562_s12, 53248  ;;  %p2564_p0 = scmp.lt.s32.totalorder %s2875_s29, %s2562_s12 }
  0x38   : > { %p2559_p4 = pnand %p2557_p10, %p2883_p5  ;;  %p2565_p8 = scmp.lt.s32.totalorder %s2563_s14, %s2556_s20 }
  0x3a   : > { %p2560_p12 = pneg %p2559_p4  ;;  %p2566_p9 = por %p2565_p8, %p2564_p0 }
  0x3c   : > { %p2567_p11 = pnand %p2566_p9, %p2560_p12 }
  0x3e   : > { %2570 = shalt.err (!%p2567_p11)
}
  0x3f   : > { %s2731_s8 = smov 16640   ;;  %s2732_s17 = smov 3328  }
  0x40   : > { %s2733_s24 = smov 208   ;;  %s2734_s25 = smov [#allocation2]  }
  0x41   : > { %2405 = dma.hbm_to_vmem [thread:$0]  (!%p2854_p13), %s2873_s23, 26624, %s2875_s29, %s2877_s10, %s2731_s8, %s2732_s17, %s2733_s24  }
  0x42   : > { %s258_s26 = sshll.u32 %s2734_s25, 4  ;;  %p3457_p2 = scmp.ne.s32.totalorder %s3454_s19, 0  ;;  %s259_s26 = int_to_ptr.vmem [resolvable:$true] %s258_s26 }
  0x43   : > { %s2582_s13 = scalar_lea.vmem %s259_s26, 512  ;;  %p2590_p11 = scmp.lt.s32.totalorder %s259_s26, %s259_s26 }
  0x44   : > { %p2583_p1 = scmp.ne.s32.totalorder %s259_s26, %s2582_s13  ;;  %p3458_p3 = pneg %p3457_p2 }
  0x45   : > { %p2591_p0 = scmp.lt.s32.totalorder %s2582_s13, %s2582_s13 }
  0x46   : > { %p2585_p8 = pnand %p2583_p1, %p3458_p3 }
  0x47   : > { %p2592_p6 = por %p2591_p0, %p2590_p11 }
  0x48   : > { %p2586_p9 = pneg %p2585_p8 }
  0x4a   : > { %p2593_p7 = pnand %p2592_p6, %p2586_p9 }
  0x4c   : > { %2596 = shalt.err (!%p2593_p7)
}
  0x4d   : > { %s2735_s27 = smov 128   ;;  %s2736_s29 = smov 8  }
  0x4e   : > { %2395 = dma.hbm_to_vmem [thread:$0]  (!%p3457_p2), %s3431_s2, 512, %s259_s26, [#allocation3], %s2735_s27, %s2735_s27, %s2736_s29  }
  0x4f   : > { %s2370_s11 = smul.u32 26, %s2850_s21  ;;  %s2737_s12 = smov [#allocation6]  }
  0x50   : > { %s285_s14 = sshll.u32 %s2737_s12, 4  ;;  %s2351_s8 = smul.u32 416, %s2725_s30  ;;  %s286_s14 = int_to_ptr.vmem [resolvable:$true] %s285_s14 }
  0x51   : > { %s2608_s17 = scalar_lea.vmem %s286_s14, 32  ;;  %p3459_p4 = pmov %p3458_p3 }
  0x52   : > { %p2609_p10 = scmp.ne.s32.totalorder %s286_s14, %s2608_s17  ;;  %p2616_p3 = scmp.lt.s32.totalorder %s286_s14, %s286_s14 }
  0x53   : > { %p2617_p8 = scmp.lt.s32.totalorder %s2608_s17, %s2608_s17 }
  0x54   : > { %p2611_p12 = pnand %p2609_p10, %p3459_p4 }
  0x55   : > { %p2618_p9 = por %p2617_p8, %p2616_p3 }
  0x56   : > { %p2612_p1 = pneg %p2611_p12 }
  0x58   : > { %p2619_p11 = pnand %p2618_p9, %p2612_p1 }
  0x5a   : > { %2622 = shalt.err (!%p2619_p11)
}
  0x5b   : > { %2401 = dma.hbm_to_vmem [thread:$0]  (!%p3457_p2), %s3433_s4, 32, %s286_s14, [#allocation5]  }
  0x5c   : > { %s327_s27 = scalar_lea.hbm %s3435_s6, %s2351_s8  ;;  %s321_s29 = scalar_lea.vmem [#allocation9], %s2370_s11 }
  0x5d   : > { %s329_s23 = sshll.u32 %s321_s29, 4  ;;  %s2623_s20 = scalar_lea.hbm %s327_s27, 416  ;;  %s330_s23 = int_to_ptr.vmem [resolvable:$true] %s329_s23 }
  0x5e   : > { %p2624_p0 = scmp.ne.s32.totalorder %s327_s27, %s2623_s20  ;;  %s2628_s17 = scalar_lea.hbm %s3435_s6, 2080 }
  0x5f   : > { %p2629_p2 = scmp.lt.s32.totalorder %s327_s27, %s3435_s6  ;;  %p2630_p10 = scmp.lt.s32.totalorder %s2628_s17, %s2623_s20 }
  0x60   : > { %p2626_p6 = pnand %p2624_p0, %p2883_p5 }
  0x61   : > { %p2631_p4 = por %p2630_p10, %p2629_p2 }
  0x62   : > { %p2627_p7 = pneg %p2626_p6 }
  0x64   : > { %p2632_p12 = pnand %p2631_p4, %p2627_p7 }
  0x66   : > { %2635 = shalt.err (!%p2632_p12)
}
  0x67   : > { %s2636_s25 = scalar_lea.vmem %s330_s23, 416  ;;  %s2738_s26 = smov [#allocation9]  }
  0x68   : > { %p2637_p1 = scmp.ne.s32.totalorder %s330_s23, %s2636_s25  ;;  %s2641_s13 = sshll.u32 %s2738_s26, 4  ;;  %s2642_s13 = int_to_ptr.vmem [resolvable:$false] %s2641_s13 }
  0x69   : > { %s2643_s29 = scalar_lea.vmem %s2642_s13, 832  ;;  %p2644_p9 = scmp.lt.s32.totalorder %s330_s23, %s2642_s13 }
  0x6a   : > { %p2639_p3 = pnand %p2637_p1, %p2883_p5  ;;  %p2645_p11 = scmp.lt.s32.totalorder %s2643_s29, %s2636_s25 }
  0x6c   : > { %p2640_p8 = pneg %p2639_p3  ;;  %p2646_p0 = por %p2645_p11, %p2644_p9 }
  0x6e   : > { %p2647_p6 = pnand %p2646_p0, %p2640_p8 }
  0x70   : > { %2650 = shalt.err (!%p2647_p6)
}
  0x71   : > { %2408 = dma.hbm_to_vmem [thread:$0]  (!%p2854_p13), %s327_s27, 416, %s330_s23, %s2877_s10  }
  0x72   : > { %s2949_s12 = scalar_lea.hbm %s3436_s7, %s2351_s8  ;;  %s340_s17 = scalar_lea.vmem [#allocation10], %s2370_s11 }
  0x73   : > { %s348_s24 = sshll.u32 %s340_s17, 4  ;;  %s337_s14 = scalar_lea.sflag [#allocation11], %s2850_s21  ;;  %s349_s24 = int_to_ptr.vmem [resolvable:$true] %s348_s24 }
  0x74   : > { %s2651_s25 = scalar_lea.hbm %s2949_s12, 416  ;;  %s2656_s27 = scalar_lea.hbm %s3436_s7, 2080 }
  0x75   : > { %p2652_p7 = scmp.ne.s32.totalorder %s2949_s12, %s2651_s25  ;;  %p2657_p4 = scmp.lt.s32.totalorder %s2949_s12, %s3436_s7 }
  0x76   : > { %p2658_p12 = scmp.lt.s32.totalorder %s2656_s27, %s2651_s25 }
  0x77   : > { %p2654_p2 = pnand %p2652_p7, %p2883_p5 }
  0x78   : > { %p2659_p1 = por %p2658_p12, %p2657_p4 }
  0x79   : > { %p2655_p10 = pneg %p2654_p2 }
  0x7b   : > { %p2660_p3 = pnand %p2659_p1, %p2655_p10 }
  0x7d   : > { %2663 = shalt.err (!%p2660_p3)
}
  0x7e   : > { %s2664_s11 = scalar_lea.vmem %s349_s24, 416  ;;  %s2739_s21 = smov [#allocation10]  }
  0x7f   : > { %p2665_p8 = scmp.ne.s32.totalorder %s349_s24, %s2664_s11  ;;  %s2669_s26 = sshll.u32 %s2739_s21, 4  ;;  %s2670_s26 = int_to_ptr.vmem [resolvable:$false] %s2669_s26 }
  0x80   : > { %s2671_s13 = scalar_lea.vmem %s2670_s26, 832  ;;  %p2672_p0 = scmp.lt.s32.totalorder %s349_s24, %s2670_s26 }
  0x81   : > { %p2667_p9 = pnand %p2665_p8, %p2883_p5  ;;  %p2673_p6 = scmp.lt.s32.totalorder %s2671_s13, %s2664_s11 }
  0x83   : > { %p2668_p11 = pneg %p2667_p9  ;;  %p2674_p7 = por %p2673_p6, %p2672_p0 }
  0x85   : > { %p2675_p2 = pnand %p2674_p7, %p2668_p11 }
  0x87   : > { %2678 = shalt.err (!%p2675_p2)
}
  0x88   : > { %2411 = dma.hbm_to_vmem [thread:$0]  (!%p2854_p13), %s2949_s12, 416, %s349_s24, %s337_s14  }
  0x89   : > { %p3460_p10 = scmp.ne.s32.totalorder %s3453_s16, 0 }
  0x8a   : > { %p3461_p4 = scmp.eq.s32.totalorder (!%p3460_p10), %s2807_s9, 0 }
  0x8b   : > { %357 = sbr.rel (%p3460_p10) target bundleno = 1280 (0x500), region = 52 }
  0x90   : > { %2696 = dma.done.wait (%p3461_p4), [#allocation3], 512   ;;  %p3462_p5 = pmov %p3461_p4 }
  0x91   : > { %p3463_p12 = pmov %p3461_p4 }
  0x92   : > { %2698 = vsyncadd (%p3462_p5), [#allocation3], 4294966784 }
  0x93   : > { %2700 = dma.done.wait (%p3463_p12), [#allocation5], 4128   ;;  %p3464_p1 = pmov %p3461_p4 }
  0x94   : > { %s371_s22 = sand.u32 1, %s2807_s9   ;;  %s373_s18 = sand.u32 1, %s2717_s28  }
  0x95   : > { %2702 = vsyncadd (%p3464_p1), [#allocation5], 4294963168  ;;  %s2372_s29 = smul.u32 1664, %s373_s18  ;;  %s372_s16 = scalar_lea.sflag [#allocation8], %s371_s22 }
  0x96   : > { %p3465_p13 = scmp.ne.s32.totalorder %s3452_s15, 0 }
  0x97   : > { %s2982_s20 = scalar_lea.vmem [#allocation7], %s2372_s29 }
  0x98   : > { %2704 = dma.done.wait (%p3465_p13), %s372_s16, 27040  }
  0x99   : > { %2706 = vsyncadd (%p3465_p13), %s372_s16, 4294940256  ;;  %s2373_s19 = smul.u32 26, %s373_s18  ;;  %s390_s17 = scalar_lea.sflag [#allocation11], %s373_s18 }
  0x9b   : > { %s2988_s12 = scalar_lea.vmem [#allocation9], %s2373_s19  ;;  %s2990_s24 = scalar_lea.vmem [#allocation10], %s2373_s19 }
  0x9c   : > { %2708 = dma.done.wait (%p3465_p13), %s390_s17, 416  }
  0x9d   : > { %2710 = vsyncadd (%p3465_p13), %s390_s17, 4294966880  ;;  %v2740_v0 = vmov 0   ;;  %v2741_v1 = vmov 0.0   ;;  %vm2742_vm0 = vmmov 0   ;;  %v445_v2 = vld [vmem:[%s3430_s1] sm:$0xff]  ;;  %v457_v3 = vld [vmem:[#allocation2 + $0x18] sm:$0xff]  ;;  %v446_v8 = vlaneseq }
  0x9e   : > { %2464 = vset.pattern.permute.xlu0 %v2740_v0  ;;  %2358 = vmatprep.subr.mxu1 %v2741_v1  ;;  %v456_v4 = vld [vmem:[#allocation2 + $0x10] sm:$0xff]  ;;  %v455_v5 = vld [vmem:[#allocation2 + $0x8] sm:$0xff]  ;;  %v454_v6 = vld [vmem:[#allocation2] sm:$0xff]  ;;  %vm458_vm1 = vcmask 261120   ;;  %s439_s30 = smul.u32 26, %s2807_s9  ;;  %s3467_s11 = sld [smem:[#allocation19_spill]] }
  0x9f   : > { %2366 = vmatprep.mubr.msk.f32.mxu1 %vm2742_vm0, %v2741_v1  ;;  %449 = vperm.xlu0 %2464, %v445_v2   ;;  %v565_v7 = vld [vmem:[#allocation4 + $0xf8] sm:$0xff]  ;;  %v447_v9 = vand.u32 127, %v446_v8  ;;  %v564_v11 = vld [vmem:[#allocation4 + $0xf0] sm:$0xff]  ;;  %v563_v13 = vld [vmem:[#allocation4 + $0xe8] sm:$0xff] }
  0xa0   : > { %2359 = vmatpush3.msra.mxu1 %v457_v3  ;;  %v562_v14 = vld [vmem:[#allocation4 + $0xe0] sm:$0xff]  ;;  %v561_v15 = vld [vmem:[#allocation4 + $0xd8] sm:$0xff]  ;;  %v560_v16 = vld [vmem:[#allocation4 + $0xd0] sm:$0xff]  ;;  %p3207_p3 = scmp.lt.s32.totalorder %s439_s30, 129 }
  0xa1   : > { %2360 = vmatprep.subr.mxu1 %v2741_v1  ;;  %v559_v17 = vld [vmem:[#allocation4 + $0xc8] sm:$0xff]  ;;  %v558_v18 = vld [vmem:[#allocation4 + $0xc0] sm:$0xff]  ;;  %v557_v19 = vld [vmem:[#allocation4 + $0xb8] sm:$0xff] }
  0xa2   : > { %2361 = vmatpush3.msra.mxu1 %v456_v4  ;;  %v556_v20 = vld [vmem:[#allocation4 + $0xb0] sm:$0xff]  ;;  %v555_v21 = vld [vmem:[#allocation4 + $0xa8] sm:$0xff]  ;;  %v554_v22 = vld [vmem:[#allocation4 + $0xa0] sm:$0xff]  ;;  %s3474_s30 = smov (!%p3207_p3, %s439_s30), 129 }
  0xa3   : > { %2362 = vmatprep.subr.mxu1 %v2741_v1  ;;  %v553_v23 = vld [vmem:[#allocation4 + $0x98] sm:$0xff]  ;;  %v552_v24 = vld [vmem:[#allocation4 + $0x90] sm:$0xff]  ;;  %v551_v25 = vld [vmem:[#allocation4 + $0x88] sm:$0xff]  ;;  %s2345_s23 = sshll.u32 %s3474_s30, 3 }
  0xa4   : > { %2363 = vmatpush3.msra.mxu1 %v455_v5  ;;  %v550_v26 = vld [vmem:[#allocation4 + $0x80] sm:$0xff]  ;;  %v549_v27 = vld [vmem:[#allocation4 + $0x78] sm:$0xff]  ;;  %v548_v28 = vld [vmem:[#allocation4 + $0x70] sm:$0xff]  ;;  %s3223_s21 = scalar_lea.vmem %s3467_s11, %s2345_s23 }
  0xa5   : > { %2364 = vmatprep.subr.mxu1 %v2741_v1  ;;  %v547_v29 = vld [vmem:[#allocation4 + $0x68] sm:$0xff]  ;;  %v546_v30 = vld [vmem:[#allocation4 + $0x60] sm:$0xff]  ;;  %v545_v31 = vld [vmem:[#allocation4 + $0x58] sm:$0xff] }
  0xa6   : > { %2365 = vmatpush3.msra.mxu1 %v454_v6  ;;  %v544_v32 = vld [vmem:[#allocation4 + $0x50] sm:$0xff]  ;;  %v543_v33 = vld [vmem:[#allocation4 + $0x48] sm:$0xff]  ;;  %v542_v34 = vld [vmem:[#allocation4 + $0x40] sm:$0xff] }
  0xa7   : > { %578 = vmatprep.subr.mxu1 %v565_v7  ;;  %v541_v35 = vld [vmem:[#allocation4 + $0x38] sm:$0xff]  ;;  %v540_v36 = vld [vmem:[#allocation4 + $0x30] sm:$0xff]  ;;  %v539_v37 = vld [vmem:[#allocation4 + $0x28] sm:$0xff] }
  0xa8   : > { %v538_v38 = vld [vmem:[#allocation4 + $0x20] sm:$0xff]  ;;  %v537_v39 = vld [vmem:[#allocation4 + $0x18] sm:$0xff]  ;;  %v536_v40 = vld [vmem:[#allocation4 + $0x10] sm:$0xff] }
  0xa9   : > { %v535_v41 = vld [vmem:[#allocation4 + $0x8] sm:$0xff]  ;;  %v534_v42 = vld [vmem:[#allocation4] sm:$0xff]  ;;  %v731_v45 = vld [vmem:[%s2982_s20 + $0x270] sm:$0xff] }
  0xaa   : > { %v732_v43 = vld [vmem:[%s2982_s20 + $0x278] sm:$0xff]  ;;  %v3002_v44 = vld [vmem:[%s2982_s20 + $0x288] sm:$0xff]  ;;  %v1043_v49 = vunpack.c.h.s8.bf16 %v731_v45  ;;  %v1017_v50 = vunpack.c.l.s8.bf16 %v731_v45  ;;  %v705_v53 = vld [vmem:[%s2982_s20 + $0x1a0] sm:$0xff] }
  0xab   : > { %v1018_v46 = vunpack.c.l.s8.bf16 %v732_v43  ;;  %v1044_v47 = vunpack.c.h.s8.bf16 %v732_v43  ;;  %v1046_v48 = vunpack.c.h.s8.bf16 %v3002_v44  ;;  %v706_v51 = vld [vmem:[%s2982_s20 + $0x1a8] sm:$0xff]  ;;  %v991_v54 = vunpack.c.h.s8.bf16 %v705_v53  ;;  %v680_v57 = vld [vmem:[%s2982_s20 + $0xd8] sm:$0xff]  ;;  %v679_v59 = vld [vmem:[%s2982_s20 + $0xd0] sm:$0xff] }
  0xac   : > { %v992_v52 = vunpack.c.h.s8.bf16 %v706_v51  ;;  %v966_v55 = vunpack.c.l.s8.bf16 %v706_v51  ;;  %v965_v56 = vunpack.c.l.s8.bf16 %v705_v53  ;;  %v940_v58 = vunpack.c.h.s8.bf16 %v680_v57  ;;  %v654_v63 = vld [vmem:[%s2982_s20 + $0x8] sm:$0xff]  ;;  %v836_v5 = vld [vmem:[%s2982_s20 + $0x5b8] sm:$0xff]  ;;  %v835_v7 = vld [vmem:[%s2982_s20 + $0x5b0] sm:$0xff] }
  0xad   : > { %1277 = vmatprep.subr.bf16.mxu0 %v1044_v47  ;;  %v939_v60 = vunpack.c.h.s8.bf16 %v679_v59  ;;  %v914_v61 = vunpack.c.l.s8.bf16 %v680_v57  ;;  %v913_v62 = vunpack.c.l.s8.bf16 %v679_v59  ;;  %v888_v0 = vunpack.c.h.s8.bf16 %v654_v63  ;;  %v656_v43 = vld [vmem:[%s2982_s20 + $0x18] sm:$0xff] }
  0xae   : > { %1278 = vmatpush1.bf16.msra.mxu0 %v1043_v49  ;;  %v862_v3 = vunpack.c.l.s8.bf16 %v654_v63  ;;  %v1252_v6 = vunpack.c.h.s8.bf16 %v836_v5  ;;  %v890_v45 = vunpack.c.h.s8.bf16 %v656_v43  ;;  %v838_v49 = vld [vmem:[%s2982_s20 + $0x5c8] sm:$0xff] }
  0xaf   : > { %1279 = vmatprep.subr.bf16.mxu0 %v1018_v46  ;;  %v655_v46 = vld [vmem:[%s2982_s20 + $0x10] sm:$0xff]  ;;  %v1254_v51 = vunpack.c.h.s8.bf16 %v838_v49 }
  0xb0   : > { %v889_v47 = vunpack.c.h.s8.bf16 %v655_v46 }
  0xb2   : > { %1280 = vmatpush1.bf16.msra.mxu0 %v1017_v50  ;;  %v863_v50 = vunpack.c.l.s8.bf16 %v655_v46  ;;  %v709_v46 = vld [vmem:[%s2982_s20 + $0x1c0] sm:$0xff] }
  0xb3   : > { %1281 = vmatprep.subr.bf16.mxu0 %v992_v52  ;;  %v837_v52 = vld [vmem:[%s2982_s20 + $0x5c0] sm:$0xff] }
  0xb4   : > { %v1253_v53 = vunpack.c.h.s8.bf16 %v837_v52 }
  0xb6   : > { %1282 = vmatpush1.bf16.msra.mxu0 %v991_v54  ;;  %v1228_v54 = vunpack.c.l.s8.bf16 %v838_v49 }
  0xb7   : > { %1283 = vmatprep.subr.bf16.mxu0 %v966_v55  ;;  %v812_v55 = vld [vmem:[%s2982_s20 + $0x4f8] sm:$0xff] }
  0xb8   : > { %v1202_v57 = vunpack.c.h.s8.bf16 %v812_v55 }
  0xba   : > { %1284 = vmatpush1.bf16.msra.mxu0 %v965_v56  ;;  %v1227_v56 = vunpack.c.l.s8.bf16 %v837_v52  ;;  %v684_v52 = vld [vmem:[%s2982_s20 + $0xf8] sm:$0xff] }
  0xbb   : > { %1285 = vmatprep.subr.bf16.mxu0 %v940_v58  ;;  %v811_v58 = vld [vmem:[%s2982_s20 + $0x4f0] sm:$0xff] }
  0xbc   : > { %v1201_v59 = vunpack.c.h.s8.bf16 %v811_v58 }
  0xbe   : > { %1286 = vmatpush1.bf16.msra.mxu0 %v939_v60  ;;  %v1176_v60 = vunpack.c.l.s8.bf16 %v812_v55 }
  0xbf   : > { %1287 = vmatprep.subr.bf16.mxu0 %v914_v61  ;;  %v786_v61 = vld [vmem:[%s2982_s20 + $0x428] sm:$0xff] }
  0xc0   : > { %v1150_v63 = vunpack.c.h.s8.bf16 %v786_v61 }
  0xc2   : > { %1288 = vmatpush1.bf16.msra.mxu0 %v913_v62  ;;  %v1175_v62 = vunpack.c.l.s8.bf16 %v811_v58  ;;  %v683_v58 = vld [vmem:[%s2982_s20 + $0xf0] sm:$0xff] }
  0xc3   : > { %1289 = vmatprep.subr.bf16.mxu0 %v888_v0  ;;  %v785_v0 = vld [vmem:[%s2982_s20 + $0x420] sm:$0xff] }
 0x11a   : > { %v450_v10 = vpop.permute.xlu0 %449 }
 0x11b   : > { %vm451_vm2 = vcmp.eq.s32.totalorder %v450_v10, %v447_v9  ;;  %v1251_v9 = vunpack.c.h.s8.bf16 %v835_v7  ;;  %v1226_v10 = vunpack.c.l.s8.bf16 %v836_v5  ;;  %v760_v5 = vld [vmem:[%s2982_s20 + $0x358] sm:$0xff] }
 0x11c   : > { %v2346_v12 = vsel %vm451_vm2, 1.0, %v2741_v1 }
 0x11d   : > { %2367 = vmatmul.mubr.msk.f32.vlgmr.msra.gmra.mxu1 %vm458_vm1, %v2346_v12  ;;  %v810_v12 = vld [vmem:[%s2982_s20 + $0x4e8] sm:$0xff] }
 0x11e   : > { %579 = vmatpush1.msra.mxu1 %v564_v11  ;;  %642 = vmatprep.mubr.f32.mxu1 %v2741_v1  ;;  %v653_v1 = vld [vmem:[%s2982_s20] sm:$0xff]  ;;  %v1225_v11 = vunpack.c.l.s8.bf16 %v835_v7  ;;  %v1098_v7 = vunpack.c.h.s8.bf16 %v760_v5 }
 0x11f   : > { %580 = vmatprep.subr.mxu1 %v563_v13  ;;  %v887_v2 = vunpack.c.h.s8.bf16 %v653_v1  ;;  %v861_v4 = vunpack.c.l.s8.bf16 %v653_v1  ;;  %v1200_v13 = vunpack.c.h.s8.bf16 %v810_v12  ;;  %v1149_v1 = vunpack.c.h.s8.bf16 %v785_v0 }
 0x120   : > { %581 = vmatpush1.msra.mxu1 %v562_v14  ;;  %v809_v14 = vld [vmem:[%s2982_s20 + $0x4e0] sm:$0xff] }
 0x121   : > { %582 = vmatprep.subr.mxu1 %v561_v15  ;;  %1290 = vmatpush1.bf16.msra.mxu0 %v887_v2  ;;  %v1199_v15 = vunpack.c.h.s8.bf16 %v809_v14  ;;  %v1124_v2 = vunpack.c.l.s8.bf16 %v786_v61 }
 0x122   : > { %583 = vmatpush1.msra.mxu1 %v560_v16  ;;  %1291 = vmatprep.subr.bf16.mxu0 %v862_v3  ;;  %v1174_v16 = vunpack.c.l.s8.bf16 %v810_v12  ;;  %v1123_v3 = vunpack.c.l.s8.bf16 %v785_v0  ;;  %v658_v0 = vld [vmem:[%s2982_s20 + $0x28] sm:$0xff] }
 0x123   : > { %584 = vmatprep.subr.mxu1 %v559_v17  ;;  %v1173_v17 = vunpack.c.l.s8.bf16 %v809_v14  ;;  %v1072_v14 = vunpack.c.l.s8.bf16 %v760_v5 }
 0x124   : > { %585 = vmatpush1.msra.mxu1 %v558_v18  ;;  %v784_v18 = vld [vmem:[%s2982_s20 + $0x418] sm:$0xff] }
 0x125   : > { %586 = vmatprep.subr.mxu1 %v557_v19  ;;  %1292 = vmatpush1.bf16.msra.mxu0 %v861_v4  ;;  %v1148_v19 = vunpack.c.h.s8.bf16 %v784_v18  ;;  %v758_v4 = vld [vmem:[%s2982_s20 + $0x348] sm:$0xff] }
 0x126   : > { %587 = vmatpush1.msra.mxu1 %v556_v20  ;;  %1293 = vmatprep.subr.bf16.mxu0 %v1252_v6  ;;  %v783_v20 = vld [vmem:[%s2982_s20 + $0x410] sm:$0xff]  ;;  %v1096_v6 = vunpack.c.h.s8.bf16 %v758_v4 }
 0x127   : > { %588 = vmatprep.subr.mxu1 %v555_v21  ;;  %v1147_v21 = vunpack.c.h.s8.bf16 %v783_v20 }
 0x128   : > { %589 = vmatpush1.msra.mxu1 %v554_v22  ;;  %v1122_v22 = vunpack.c.l.s8.bf16 %v784_v18  ;;  %v738_v18 = vld [vmem:[%s2982_s20 + $0x2a8] sm:$0xff] }
 0x129   : > { %590 = vmatprep.subr.mxu1 %v553_v23  ;;  %1294 = vmatpush2.bf16.msra.mxu0 %v1251_v9  ;;  %v1121_v23 = vunpack.c.l.s8.bf16 %v783_v20  ;;  %v757_v9 = vld [vmem:[%s2982_s20 + $0x340] sm:$0xff]  ;;  %v1050_v20 = vunpack.c.h.s8.bf16 %v738_v18 }
 0x12a   : > { %591 = vmatpush1.msra.mxu1 %v552_v24  ;;  %1295 = vmatprep.subr.bf16.mxu0 %v1226_v10  ;;  %v733_v24 = vld [vmem:[%s2982_s20 + $0x280] sm:$0xff]  ;;  %v759_v10 = vld [vmem:[%s2982_s20 + $0x350] sm:$0xff] }
 0x12b   : > { %592 = vmatprep.subr.mxu1 %v551_v25  ;;  %v532_v25 = vld [vmem:[%s3429_s0] sm:$0xff]  ;;  %v1097_v12 = vunpack.c.h.s8.bf16 %v759_v10 }
 0x12c   : > { %593 = vmatpush1.msra.mxu1 %v550_v26 }
 0x12d   : > { %594 = vmatprep.subr.mxu1 %v549_v27  ;;  %1296 = vmatpush2.bf16.msra.mxu0 %v1225_v11  ;;  %v1045_v27 = vunpack.c.h.s8.bf16 %v733_v24  ;;  %v1095_v11 = vunpack.c.h.s8.bf16 %v757_v9 }
 0x12e   : > { %595 = vmatpush1.msra.mxu1 %v548_v28  ;;  %1297 = vmatprep.subr.bf16.mxu0 %v1200_v13  ;;  %v1070_v13 = vunpack.c.l.s8.bf16 %v758_v4  ;;  %v892_v4 = vunpack.c.h.s8.bf16 %v658_v0 }
 0x12f   : > { %596 = vmatprep.subr.mxu1 %v547_v29  ;;  %v1020_v29 = vunpack.c.l.s8.bf16 %v3002_v44 }
 0x130   : > { %597 = vmatpush1.msra.mxu1 %v546_v30 }
 0x131   : > { %598 = vmatprep.subr.mxu1 %v545_v31  ;;  %1298 = vmatpush2.bf16.msra.mxu0 %v1199_v15  ;;  %v708_v31 = vld [vmem:[%s2982_s20 + $0x1b8] sm:$0xff]  ;;  %v1069_v15 = vunpack.c.l.s8.bf16 %v757_v9 }
 0x132   : > { %599 = vmatpush1.msra.mxu1 %v544_v32  ;;  %1299 = vmatprep.subr.bf16.mxu0 %v1174_v16  ;;  %v1019_v32 = vunpack.c.l.s8.bf16 %v733_v24  ;;  %v1071_v16 = vunpack.c.l.s8.bf16 %v759_v10 }
 0x133   : > { %600 = vmatprep.subr.mxu1 %v543_v33  ;;  %v994_v33 = vunpack.c.h.s8.bf16 %v708_v31 }
 0x134   : > { %601 = vmatpush1.msra.mxu1 %v542_v34  ;;  %v707_v34 = vld [vmem:[%s2982_s20 + $0x1b0] sm:$0xff] }
 0x135   : > { %602 = vmatprep.subr.mxu1 %v541_v35  ;;  %1300 = vmatpush2.bf16.msra.mxu0 %v1173_v17  ;;  %v993_v35 = vunpack.c.h.s8.bf16 %v707_v34  ;;  %v736_v17 = vld [vmem:[%s2982_s20 + $0x298] sm:$0xff] }
 0x136   : > { %603 = vmatpush1.msra.mxu1 %v540_v36  ;;  %1301 = vmatprep.subr.bf16.mxu0 %v1148_v19  ;;  %v968_v36 = vunpack.c.l.s8.bf16 %v708_v31  ;;  %v1048_v19 = vunpack.c.h.s8.bf16 %v736_v17 }
 0x137   : > { %604 = vmatprep.subr.mxu1 %v539_v37  ;;  %v682_v37 = vld [vmem:[%s2982_s20 + $0xe8] sm:$0xff] }
 0x138   : > { %605 = vmatpush1.msra.mxu1 %v538_v38  ;;  %v967_v38 = vunpack.c.l.s8.bf16 %v707_v34 }
 0x139   : > { %606 = vmatprep.subr.mxu1 %v537_v39  ;;  %1302 = vmatpush2.bf16.msra.mxu0 %v1147_v21  ;;  %v942_v39 = vunpack.c.h.s8.bf16 %v682_v37  ;;  %v3042_v21 = vshrl.u32 %v446_v8, 7  ;;  %v735_v8 = vld [vmem:[%s2982_s20 + $0x290] sm:$0xff] }
 0x13a   : > { %607 = vmatpush1.msra.mxu1 %v536_v40  ;;  %1303 = vmatprep.subr.bf16.mxu0 %v1122_v22  ;;  %v681_v40 = vld [vmem:[%s2982_s20 + $0xe0] sm:$0xff] }
 0x13b   : > { %608 = vmatprep.subr.mxu1 %v535_v41  ;;  %v941_v41 = vunpack.c.h.s8.bf16 %v681_v40  ;;  %v915_v44 = vunpack.c.l.s8.bf16 %v681_v40  ;;  %v3045_v22 = vsub.s32 0, %v3042_v21  ;;  %v3048_v24 = vsub.s32 1, %v3042_v21  ;;  %v710_v40 = vld [vmem:[%s2982_s20 + $0x1c8] sm:$0xff] }
 0x13c   : > { %609 = vmatpush1.msra.mxu1 %v534_v42  ;;  %v916_v42 = vunpack.c.l.s8.bf16 %v682_v37 }
 0x13d   : > { %1318 = vmatprep.subr.bf16.mxu1 %v1046_v48  ;;  %1304 = vmatpush2.bf16.msra.mxu0 %v1121_v23  ;;  %v864_v48 = vunpack.c.l.s8.bf16 %v656_v43  ;;  %v566_v23 = vld [vmem:[#allocation6] sm:$0x3] }
 0x13e   : > { %1305 = vmatprep.subr.bf16.mxu0 %v1096_v6  ;;  %v657_v6 = vld [vmem:[%s2982_s20 + $0x20] sm:$0xff] }
 0x13f   : > { %v891_v9 = vunpack.c.h.s8.bf16 %v657_v6 }
 0x141   : > { %1306 = vmatpush2.bf16.msra.mxu0 %v1095_v11  ;;  %v866_v11 = vunpack.c.l.s8.bf16 %v658_v0 }
 0x142   : > { %1307 = vmatprep.subr.bf16.mxu0 %v1070_v13  ;;  %v840_v13 = vld [vmem:[%s2982_s20 + $0x5d8] sm:$0xff] }
 0x145   : > { %1308 = vmatpush2.bf16.msra.mxu0 %v1069_v15  ;;  %v865_v15 = vunpack.c.l.s8.bf16 %v657_v6 }
 0x146   : > { %1359 = vmatprep.subr.bf16.mxu0 %v1048_v19  ;;  %v839_v19 = vld [vmem:[%s2982_s20 + $0x5d0] sm:$0xff] }
 0x1dd   : > { %v528_v26 = vpop.f32.mrf.mxu1 }
 0x1de   : > { %v533_v28 = vmul.f32 %v532_v25, %v528_v26  ;;  %v571_v25 = vrot.slane %v566_v23, %v3045_v22  ;;  %v575_v26 = vrot.slane %v566_v23, %v3048_v24  ;;  %v1255_v23 = vunpack.c.h.s8.bf16 %v839_v19 }
 0x1df   : > { %v2368_v30 = vpop.f32.mrf.mxu1 }
 0x1e0   : > { %643 = vmatmul.mubr.f32.vlgmr.msra.gmra.mxu1 %v533_v28 }
 0x1e1   : > { %1319 = vmatpush1.bf16.msra.mxu1 %v1045_v27 }
 0x1e2   : > { %1320 = vmatprep.subr.bf16.mxu1 %v1020_v29 }
 0x1e5   : > { %1321 = vmatpush1.bf16.msra.mxu1 %v1019_v32  ;;  %v737_v32 = vld [vmem:[%s2982_s20 + $0x2a0] sm:$0xff] }
 0x1e6   : > { %1322 = vmatprep.subr.bf16.mxu1 %v994_v33  ;;  %v1023_v43 = vunpack.c.l.s8.bf16 %v737_v32 }
 0x1e9   : > { %1323 = vmatpush1.bf16.msra.mxu1 %v993_v35  ;;  %v1047_v35 = vunpack.c.h.s8.bf16 %v735_v8 }
 0x1ea   : > { %1324 = vmatprep.subr.bf16.mxu1 %v968_v36  ;;  %v1049_v36 = vunpack.c.h.s8.bf16 %v737_v32 }
 0x1ed   : > { %1325 = vmatpush1.bf16.msra.mxu1 %v967_v38  ;;  %v1022_v38 = vunpack.c.l.s8.bf16 %v736_v17  ;;  %v1256_v17 = vunpack.c.h.s8.bf16 %v840_v13 }
 0x1ee   : > { %1326 = vmatprep.subr.bf16.mxu1 %v942_v39  ;;  %v1024_v39 = vunpack.c.l.s8.bf16 %v738_v18 }
 0x1f1   : > { %1327 = vmatpush1.bf16.msra.mxu1 %v941_v41  ;;  %v712_v41 = vld [vmem:[%s2982_s20 + $0x1d8] sm:$0xff] }
 0x1f2   : > { %1328 = vmatprep.subr.bf16.mxu1 %v916_v42  ;;  %v1021_v42 = vunpack.c.l.s8.bf16 %v735_v8 }
 0x1f5   : > { %1329 = vmatpush1.bf16.msra.mxu1 %v915_v44  ;;  %v996_v44 = vunpack.c.h.s8.bf16 %v710_v40 }
 0x1f6   : > { %1330 = vmatprep.subr.bf16.mxu1 %v890_v45  ;;  %v998_v45 = vunpack.c.h.s8.bf16 %v712_v41 }
 0x1f9   : > { %1331 = vmatpush1.bf16.msra.mxu1 %v889_v47  ;;  %v711_v47 = vld [vmem:[%s2982_s20 + $0x1d0] sm:$0xff] }
 0x1fa   : > { %1332 = vmatprep.subr.bf16.mxu1 %v864_v48  ;;  %v995_v48 = vunpack.c.h.s8.bf16 %v709_v46  ;;  %v997_v49 = vunpack.c.h.s8.bf16 %v711_v47  ;;  %v971_v55 = vunpack.c.l.s8.bf16 %v711_v47  ;;  %v787_v47 = vld [vmem:[%s2982_s20 + $0x430] sm:$0xff] }
 0x1fd   : > { %1333 = vmatpush1.bf16.msra.mxu1 %v863_v50  ;;  %v970_v50 = vunpack.c.l.s8.bf16 %v710_v40 }
 0x1fe   : > { %1334 = vmatprep.subr.bf16.mxu1 %v1254_v51  ;;  %v972_v51 = vunpack.c.l.s8.bf16 %v712_v41  ;;  %v788_v41 = vld [vmem:[%s2982_s20 + $0x438] sm:$0xff] }
 0x201   : > { %1335 = vmatpush2.bf16.msra.mxu1 %v1253_v53  ;;  %v686_v53 = vld [vmem:[%s2982_s20 + $0x108] sm:$0xff] }
 0x202   : > { %1336 = vmatprep.subr.bf16.mxu1 %v1228_v54  ;;  %v969_v54 = vunpack.c.l.s8.bf16 %v709_v46 }
 0x205   : > { %1337 = vmatpush2.bf16.msra.mxu1 %v1227_v56  ;;  %v944_v56 = vunpack.c.h.s8.bf16 %v684_v52 }
 0x206   : > { %1338 = vmatprep.subr.bf16.mxu1 %v1202_v57  ;;  %v946_v57 = vunpack.c.h.s8.bf16 %v686_v53 }
 0x209   : > { %1339 = vmatpush2.bf16.msra.mxu1 %v1201_v59  ;;  %v685_v59 = vld [vmem:[%s2982_s20 + $0x100] sm:$0xff] }
 0x20a   : > { %1340 = vmatprep.subr.bf16.mxu1 %v1176_v60  ;;  %v943_v60 = vunpack.c.h.s8.bf16 %v683_v58  ;;  %v945_v61 = vunpack.c.h.s8.bf16 %v685_v59 }
 0x20d   : > { %1341 = vmatpush2.bf16.msra.mxu1 %v1175_v62  ;;  %v918_v62 = vunpack.c.l.s8.bf16 %v684_v52 }
 0x20e   : > { %1342 = vmatprep.subr.bf16.mxu1 %v1150_v63  ;;  %v920_v63 = vunpack.c.l.s8.bf16 %v686_v53  ;;  %v762_v53 = vld [vmem:[%s2982_s20 + $0x368] sm:$0xff] }
 0x211   : > { %1343 = vmatpush2.bf16.msra.mxu1 %v1149_v1  ;;  %v660_v1 = vld [vmem:[%s2982_s20 + $0x38] sm:$0xff] }
 0x212   : > { %1344 = vmatprep.subr.bf16.mxu1 %v1124_v2  ;;  %v917_v2 = vunpack.c.l.s8.bf16 %v683_v58  ;;  %v894_v5 = vunpack.c.h.s8.bf16 %v660_v1 }
 0x215   : > { %1345 = vmatpush2.bf16.msra.mxu1 %v1123_v3  ;;  %v919_v3 = vunpack.c.l.s8.bf16 %v685_v59  ;;  %v761_v59 = vld [vmem:[%s2982_s20 + $0x360] sm:$0xff] }
 0x216   : > { %1346 = vmatprep.subr.bf16.mxu1 %v1098_v7  ;;  %v659_v7 = vld [vmem:[%s2982_s20 + $0x30] sm:$0xff] }
 0x217   : > { %v893_v10 = vunpack.c.h.s8.bf16 %v659_v7 }
 0x219   : > { %1347 = vmatpush2.bf16.msra.mxu1 %v1097_v12  ;;  %v868_v12 = vunpack.c.l.s8.bf16 %v660_v1  ;;  %v740_v1 = vld [vmem:[%s2982_s20 + $0x2b8] sm:$0xff] }
 0x21a   : > { %1348 = vmatprep.subr.bf16.mxu1 %v1072_v14  ;;  %v842_v14 = vld [vmem:[%s2982_s20 + $0x5e8] sm:$0xff] }
 0x21b   : > { %v1258_v18 = vunpack.c.h.s8.bf16 %v842_v14 }
 0x21d   : > { %1349 = vmatpush2.bf16.msra.mxu1 %v1071_v16  ;;  %v867_v16 = vunpack.c.l.s8.bf16 %v659_v7  ;;  %v739_v7 = vld [vmem:[%s2982_s20 + $0x2b0] sm:$0xff] }
 0x21e   : > { %1400 = vmatprep.subr.bf16.mxu1 %v1050_v20  ;;  %v841_v20 = vld [vmem:[%s2982_s20 + $0x5e0] sm:$0xff] }
 0x2a0   : > { %v644_v27 = vpop.f32.mrf.mxu1 }
 0x2a1   : > { %v645_v28 = vadd.f32 %v644_v27, %v571_v25  ;;  %v1257_v25 = vunpack.c.h.s8.bf16 %v841_v20  ;;  %v1232_v27 = vunpack.c.l.s8.bf16 %v842_v14  ;;  %v714_v14 = vld [vmem:[%s2982_s20 + $0x1e8] sm:$0xff] }
 0x2a2   : > { %v646_v29 = vpop.f32.mrf.mxu1 }
 0x2a3   : > { %v647_v30 = vadd.f32 %v646_v29, %v575_v26  ;;  %v649_v31 = vmax.f32 %v645_v28, 0.0  ;;  %v1230_v26 = vunpack.c.l.s8.bf16 %v840_v13  ;;  %v814_v28 = vld [vmem:[%s2982_s20 + $0x508] sm:$0xff]  ;;  %v816_v29 = vld [vmem:[%s2982_s20 + $0x518] sm:$0xff] }
 0x2a4   : > { %v1204_v8 = vunpack.c.h.s8.bf16 %v814_v28  ;;  %v1206_v32 = vunpack.c.h.s8.bf16 %v816_v29  ;;  %v1180_v40 = vunpack.c.l.s8.bf16 %v816_v29  ;;  %v688_v29 = vld [vmem:[%s2982_s20 + $0x118] sm:$0xff] }
 0x2a5   : > { %v650_v33 = vmax.f32 %v647_v30, 0.0  ;;  %v3056_v37 = vpack.c.bf16 %v649_v31, %v649_v31  ;;  %v1229_v30 = vunpack.c.l.s8.bf16 %v839_v19  ;;  %v1231_v31 = vunpack.c.l.s8.bf16 %v841_v20  ;;  %v713_v19 = vld [vmem:[%s2982_s20 + $0x1e0] sm:$0xff] }
 0x2a7   : > { %v3054_v34 = vpack.c.bf16 %v650_v33, %v650_v33  ;;  %v813_v33 = vld [vmem:[%s2982_s20 + $0x500] sm:$0xff] }
 0x2a9   : > { %1309 = vmatprep.mubr.bf16.mxu0 %v3054_v34  ;;  %1350 = vmatprep.mubr.bf16.mxu1 %v3054_v34 }
 0x2aa   : > { %1310 = vmatmul.mubr.bf16.vlgmr.msra.gmra.mxu0 %v3056_v37  ;;  %1351 = vmatmul.mubr.bf16.vlgmr.msra.gmra.mxu1 %v3056_v37 }
 0x2ab   : > { %1360 = vmatpush1.bf16.msra.mxu0 %v1047_v35  ;;  %1401 = vmatpush1.bf16.msra.mxu1 %v1049_v36  ;;  %v815_v35 = vld [vmem:[%s2982_s20 + $0x510] sm:$0xff]  ;;  %v1203_v36 = vunpack.c.h.s8.bf16 %v813_v33 }
 0x2ac   : > { %1391 = vmatprep.mubr.bf16.mxu0 %v3054_v34  ;;  %1432 = vmatprep.mubr.bf16.mxu1 %v3054_v34 }
 0x2ad   : > { %1361 = vmatprep.subr.bf16.mxu0 %v1022_v38  ;;  %1402 = vmatprep.subr.bf16.mxu1 %v1024_v39  ;;  %v1205_v38 = vunpack.c.h.s8.bf16 %v815_v35  ;;  %v1178_v39 = vunpack.c.l.s8.bf16 %v814_v28 }
 0x2af   : > { %1362 = vmatpush1.bf16.msra.mxu0 %v1021_v42  ;;  %1403 = vmatpush1.bf16.msra.mxu1 %v1023_v43  ;;  %v790_v42 = vld [vmem:[%s2982_s20 + $0x448] sm:$0xff]  ;;  %v1177_v43 = vunpack.c.l.s8.bf16 %v813_v33  ;;  %v687_v33 = vld [vmem:[%s2982_s20 + $0x110] sm:$0xff] }
 0x2b0   : > { %1363 = vmatprep.subr.bf16.mxu0 %v996_v44  ;;  %1404 = vmatprep.subr.bf16.mxu1 %v998_v45  ;;  %v1179_v44 = vunpack.c.l.s8.bf16 %v815_v35  ;;  %v1152_v45 = vunpack.c.h.s8.bf16 %v788_v41  ;;  %v1154_v46 = vunpack.c.h.s8.bf16 %v790_v42  ;;  %v1128_v52 = vunpack.c.l.s8.bf16 %v790_v42  ;;  %v662_v42 = vld [vmem:[%s2982_s20 + $0x48] sm:$0xff] }
 0x2b3   : > { %1364 = vmatpush1.bf16.msra.mxu0 %v995_v48  ;;  %1405 = vmatpush1.bf16.msra.mxu1 %v997_v49  ;;  %v789_v48 = vld [vmem:[%s2982_s20 + $0x440] sm:$0xff]  ;;  %v1151_v49 = vunpack.c.h.s8.bf16 %v787_v47 }
 0x2b4   : > { %1365 = vmatprep.subr.bf16.mxu0 %v970_v50  ;;  %1406 = vmatprep.subr.bf16.mxu1 %v972_v51  ;;  %v1153_v50 = vunpack.c.h.s8.bf16 %v789_v48  ;;  %v1126_v51 = vunpack.c.l.s8.bf16 %v788_v41 }
 0x2b7   : > { %1366 = vmatpush1.bf16.msra.mxu0 %v969_v54  ;;  %1407 = vmatpush1.bf16.msra.mxu1 %v971_v55  ;;  %v764_v54 = vld [vmem:[%s2982_s20 + $0x378] sm:$0xff]  ;;  %v1125_v55 = vunpack.c.l.s8.bf16 %v787_v47  ;;  %v661_v47 = vld [vmem:[%s2982_s20 + $0x40] sm:$0xff] }
 0x2b8   : > { %1367 = vmatprep.subr.bf16.mxu0 %v944_v56  ;;  %1408 = vmatprep.subr.bf16.mxu1 %v946_v57  ;;  %v1127_v56 = vunpack.c.l.s8.bf16 %v789_v48  ;;  %v1100_v57 = vunpack.c.h.s8.bf16 %v762_v53  ;;  %v1102_v58 = vunpack.c.h.s8.bf16 %v764_v54  ;;  %v1076_v0 = vunpack.c.l.s8.bf16 %v764_v54  ;;  %v844_v54 = vld [vmem:[%s2982_s20 + $0x5f8] sm:$0xff] }
 0x2bb   : > { %1368 = vmatpush1.bf16.msra.mxu0 %v943_v60  ;;  %1409 = vmatpush1.bf16.msra.mxu1 %v945_v61  ;;  %v763_v60 = vld [vmem:[%s2982_s20 + $0x370] sm:$0xff]  ;;  %v1099_v61 = vunpack.c.h.s8.bf16 %v761_v59 }
 0x2bc   : > { %1369 = vmatprep.subr.bf16.mxu0 %v918_v62  ;;  %1410 = vmatprep.subr.bf16.mxu1 %v920_v63  ;;  %v1101_v62 = vunpack.c.h.s8.bf16 %v763_v60  ;;  %v1074_v63 = vunpack.c.l.s8.bf16 %v762_v53 }
 0x2bf   : > { %1370 = vmatpush1.bf16.msra.mxu0 %v917_v2  ;;  %1411 = vmatpush1.bf16.msra.mxu1 %v919_v3  ;;  %v742_v2 = vld [vmem:[%s2982_s20 + $0x2c8] sm:$0xff]  ;;  %v1073_v3 = vunpack.c.l.s8.bf16 %v761_v59  ;;  %v843_v59 = vld [vmem:[%s2982_s20 + $0x5f0] sm:$0xff] }
 0x2c0   : > { %1371 = vmatprep.subr.bf16.mxu0 %v892_v4  ;;  %1412 = vmatprep.subr.bf16.mxu1 %v894_v5  ;;  %v1075_v4 = vunpack.c.l.s8.bf16 %v763_v60  ;;  %v1052_v5 = vunpack.c.h.s8.bf16 %v740_v1  ;;  %v1054_v6 = vunpack.c.h.s8.bf16 %v742_v2  ;;  %v1028_v13 = vunpack.c.l.s8.bf16 %v742_v2  ;;  %v818_v2 = vld [vmem:[%s2982_s20 + $0x528] sm:$0xff] }
 0x2c3   : > { %1372 = vmatpush1.bf16.msra.mxu0 %v891_v9  ;;  %1413 = vmatpush1.bf16.msra.mxu1 %v893_v10  ;;  %v741_v9 = vld [vmem:[%s2982_s20 + $0x2c0] sm:$0xff]  ;;  %v1051_v10 = vunpack.c.h.s8.bf16 %v739_v7 }
 0x2c4   : > { %1373 = vmatprep.subr.bf16.mxu0 %v866_v11  ;;  %1414 = vmatprep.subr.bf16.mxu1 %v868_v12  ;;  %v1053_v11 = vunpack.c.h.s8.bf16 %v741_v9  ;;  %v1026_v12 = vunpack.c.l.s8.bf16 %v740_v1 }
 0x2c7   : > { %1374 = vmatpush1.bf16.msra.mxu0 %v865_v15  ;;  %1415 = vmatpush1.bf16.msra.mxu1 %v867_v16  ;;  %v716_v15 = vld [vmem:[%s2982_s20 + $0x1f8] sm:$0xff]  ;;  %v1025_v16 = vunpack.c.l.s8.bf16 %v739_v7  ;;  %v817_v7 = vld [vmem:[%s2982_s20 + $0x520] sm:$0xff] }
 0x2c8   : > { %1375 = vmatprep.subr.bf16.mxu0 %v1256_v17  ;;  %1416 = vmatprep.subr.bf16.mxu1 %v1258_v18  ;;  %v1027_v17 = vunpack.c.l.s8.bf16 %v741_v9  ;;  %v1000_v18 = vunpack.c.h.s8.bf16 %v714_v14  ;;  %v1002_v20 = vunpack.c.h.s8.bf16 %v716_v15  ;;  %v976_v28 = vunpack.c.l.s8.bf16 %v716_v15  ;;  %v792_v15 = vld [vmem:[%s2982_s20 + $0x458] sm:$0xff] }
 0x2cb   : > { %1376 = vmatpush2.bf16.msra.mxu0 %v1255_v23  ;;  %1417 = vmatpush2.bf16.msra.mxu1 %v1257_v25  ;;  %v715_v23 = vld [vmem:[%s2982_s20 + $0x1f0] sm:$0xff]  ;;  %v999_v25 = vunpack.c.h.s8.bf16 %v713_v19 }
 0x2cc   : > { %1377 = vmatprep.subr.bf16.mxu0 %v1230_v26  ;;  %1418 = vmatprep.subr.bf16.mxu1 %v1232_v27  ;;  %v1001_v26 = vunpack.c.h.s8.bf16 %v715_v23  ;;  %v974_v27 = vunpack.c.l.s8.bf16 %v714_v14 }
 0x2cf   : > { %1378 = vmatpush2.bf16.msra.mxu0 %v1229_v30  ;;  %1419 = vmatpush2.bf16.msra.mxu1 %v1231_v31  ;;  %v690_v30 = vld [vmem:[%s2982_s20 + $0x128] sm:$0xff]  ;;  %v973_v31 = vunpack.c.l.s8.bf16 %v713_v19  ;;  %v1156_v19 = vunpack.c.h.s8.bf16 %v792_v15 }
 0x2d0   : > { %1379 = vmatprep.subr.bf16.mxu0 %v1204_v8  ;;  %1420 = vmatprep.subr.bf16.mxu1 %v1206_v32  ;;  %v975_v8 = vunpack.c.l.s8.bf16 %v715_v23  ;;  %v948_v32 = vunpack.c.h.s8.bf16 %v688_v29  ;;  %v950_v35 = vunpack.c.h.s8.bf16 %v690_v30  ;;  %v924_v41 = vunpack.c.l.s8.bf16 %v690_v30  ;;  %v766_v30 = vld [vmem:[%s2982_s20 + $0x388] sm:$0xff] }
 0x2d3   : > { %1380 = vmatpush2.bf16.msra.mxu0 %v1203_v36  ;;  %1421 = vmatpush2.bf16.msra.mxu1 %v1205_v38  ;;  %v689_v36 = vld [vmem:[%s2982_s20 + $0x120] sm:$0xff]  ;;  %v947_v38 = vunpack.c.h.s8.bf16 %v687_v33 }
 0x2d4   : > { %1381 = vmatprep.subr.bf16.mxu0 %v1178_v39  ;;  %1422 = vmatprep.subr.bf16.mxu1 %v1180_v40  ;;  %v949_v39 = vunpack.c.h.s8.bf16 %v689_v36  ;;  %v922_v40 = vunpack.c.l.s8.bf16 %v688_v29 }
 0x2d7   : > { %1382 = vmatpush2.bf16.msra.mxu0 %v1177_v43  ;;  %1423 = vmatpush2.bf16.msra.mxu1 %v1179_v44  ;;  %v664_v43 = vld [vmem:[%s2982_s20 + $0x58] sm:$0xff]  ;;  %v921_v44 = vunpack.c.l.s8.bf16 %v687_v33  ;;  %v1104_v33 = vunpack.c.h.s8.bf16 %v766_v30 }
 0x2d8   : > { %1383 = vmatprep.subr.bf16.mxu0 %v1152_v45  ;;  %1424 = vmatprep.subr.bf16.mxu1 %v1154_v46  ;;  %v923_v45 = vunpack.c.l.s8.bf16 %v689_v36  ;;  %v896_v46 = vunpack.c.h.s8.bf16 %v662_v42  ;;  %v898_v48 = vunpack.c.h.s8.bf16 %v664_v43  ;;  %v872_v53 = vunpack.c.l.s8.bf16 %v664_v43  ;;  %v744_v43 = vld [vmem:[%s2982_s20 + $0x2d8] sm:$0xff] }
 0x2db   : > { %1384 = vmatpush2.bf16.msra.mxu0 %v1151_v49  ;;  %1425 = vmatpush2.bf16.msra.mxu1 %v1153_v50  ;;  %v663_v49 = vld [vmem:[%s2982_s20 + $0x50] sm:$0xff]  ;;  %v895_v50 = vunpack.c.h.s8.bf16 %v661_v47 }
 0x2dc   : > { %1385 = vmatprep.subr.bf16.mxu0 %v1126_v51  ;;  %1426 = vmatprep.subr.bf16.mxu1 %v1128_v52  ;;  %v897_v51 = vunpack.c.h.s8.bf16 %v663_v49  ;;  %v870_v52 = vunpack.c.l.s8.bf16 %v662_v42 }
 0x2df   : > { %1386 = vmatpush2.bf16.msra.mxu0 %v1125_v55  ;;  %1427 = vmatpush2.bf16.msra.mxu1 %v1127_v56  ;;  %v846_v55 = vld [vmem:[%s2982_s20 + $0x608] sm:$0xff]  ;;  %v869_v56 = vunpack.c.l.s8.bf16 %v661_v47  ;;  %v1056_v47 = vunpack.c.h.s8.bf16 %v744_v43 }
 0x2e0   : > { %1387 = vmatprep.subr.bf16.mxu0 %v1100_v57  ;;  %1428 = vmatprep.subr.bf16.mxu1 %v1102_v58  ;;  %v871_v57 = vunpack.c.l.s8.bf16 %v663_v49  ;;  %v1260_v58 = vunpack.c.h.s8.bf16 %v844_v54  ;;  %v1262_v60 = vunpack.c.h.s8.bf16 %v846_v55  ;;  %v1236_v1 = vunpack.c.l.s8.bf16 %v846_v55 }
 0x2e3   : > { %1388 = vmatpush2.bf16.msra.mxu0 %v1099_v61  ;;  %1429 = vmatpush2.bf16.msra.mxu1 %v1101_v62  ;;  %v845_v61 = vld [vmem:[%s2982_s20 + $0x600] sm:$0xff]  ;;  %v1259_v62 = vunpack.c.h.s8.bf16 %v843_v59 }
 0x2e4   : > { %1389 = vmatprep.subr.bf16.mxu0 %v1074_v63  ;;  %1430 = vmatprep.subr.bf16.mxu1 %v1076_v0  ;;  %v1261_v63 = vunpack.c.h.s8.bf16 %v845_v61  ;;  %v1234_v0 = vunpack.c.l.s8.bf16 %v844_v54  ;;  %v718_v54 = vld [vmem:[%s2982_s20 + $0x208] sm:$0xff] }
 0x2e7   : > { %1390 = vmatpush2.bf16.msra.mxu0 %v1073_v3  ;;  %1431 = vmatpush2.bf16.msra.mxu1 %v1075_v4  ;;  %v820_v3 = vld [vmem:[%s2982_s20 + $0x538] sm:$0xff]  ;;  %v1233_v4 = vunpack.c.l.s8.bf16 %v843_v59  ;;  %v1004_v59 = vunpack.c.h.s8.bf16 %v718_v54 }
 0x2e8   : > { %1441 = vmatprep.subr.bf16.mxu0 %v1052_v5  ;;  %1482 = vmatprep.subr.bf16.mxu1 %v1054_v6  ;;  %v1235_v5 = vunpack.c.l.s8.bf16 %v845_v61  ;;  %v1208_v6 = vunpack.c.h.s8.bf16 %v818_v2  ;;  %v1210_v9 = vunpack.c.h.s8.bf16 %v820_v3  ;;  %v1184_v14 = vunpack.c.l.s8.bf16 %v820_v3  ;;  %v692_v3 = vld [vmem:[%s2982_s20 + $0x138] sm:$0xff] }
 0x2ea   : > { %1392 = vmatmul.mubr.bf16.vlgmr.msra.gmra.mxu0 %v3056_v37  ;;  %1433 = vmatmul.mubr.bf16.vlgmr.msra.gmra.mxu1 %v3056_v37 }
 0x2eb   : > { %1442 = vmatpush1.bf16.msra.mxu0 %v1051_v10  ;;  %1473 = vmatprep.mubr.bf16.mxu0 %v3054_v34  ;;  %v819_v10 = vld [vmem:[%s2982_s20 + $0x530] sm:$0xff] }
 0x2ec   : > { %1483 = vmatpush1.bf16.msra.mxu1 %v1053_v11  ;;  %1514 = vmatprep.mubr.bf16.mxu1 %v3054_v34  ;;  %v1207_v11 = vunpack.c.h.s8.bf16 %v817_v7 }
 0x2ed   : > { %1443 = vmatprep.subr.bf16.mxu0 %v1026_v12  ;;  %1484 = vmatprep.subr.bf16.mxu1 %v1028_v13  ;;  %v1209_v12 = vunpack.c.h.s8.bf16 %v819_v10  ;;  %v1182_v13 = vunpack.c.l.s8.bf16 %v818_v2 }
 0x2ef   : > { %1444 = vmatpush1.bf16.msra.mxu0 %v1025_v16  ;;  %v794_v16 = vld [vmem:[%s2982_s20 + $0x468] sm:$0xff] }
 0x2f0   : > { %1485 = vmatpush1.bf16.msra.mxu1 %v1027_v17  ;;  %1445 = vmatprep.subr.bf16.mxu0 %v1000_v18  ;;  %v1181_v17 = vunpack.c.l.s8.bf16 %v817_v7  ;;  %v1183_v18 = vunpack.c.l.s8.bf16 %v819_v10  ;;  %v1158_v23 = vunpack.c.h.s8.bf16 %v794_v16  ;;  %v1132_v29 = vunpack.c.l.s8.bf16 %v794_v16  ;;  %v666_v16 = vld [vmem:[%s2982_s20 + $0x68] sm:$0xff] }
 0x2f1   : > { %1486 = vmatprep.subr.bf16.mxu1 %v1002_v20  ;;  %v791_v20 = vld [vmem:[%s2982_s20 + $0x450] sm:$0xff]  ;;  %v952_v7 = vunpack.c.h.s8.bf16 %v692_v3 }
 0x2f3   : > { %1446 = vmatpush1.bf16.msra.mxu0 %v999_v25  ;;  %v793_v25 = vld [vmem:[%s2982_s20 + $0x460] sm:$0xff] }
 0x2f4   : > { %1487 = vmatpush1.bf16.msra.mxu1 %v1001_v26  ;;  %1447 = vmatprep.subr.bf16.mxu0 %v974_v27  ;;  %v1155_v26 = vunpack.c.h.s8.bf16 %v791_v20  ;;  %v1157_v27 = vunpack.c.h.s8.bf16 %v793_v25 }
 0x2f5   : > { %1488 = vmatprep.subr.bf16.mxu1 %v976_v28  ;;  %v1130_v28 = vunpack.c.l.s8.bf16 %v792_v15 }
 0x2f7   : > { %1448 = vmatpush1.bf16.msra.mxu0 %v973_v31  ;;  %v768_v31 = vld [vmem:[%s2982_s20 + $0x398] sm:$0xff] }
 0x2f8   : > { %1489 = vmatpush1.bf16.msra.mxu1 %v975_v8  ;;  %1449 = vmatprep.subr.bf16.mxu0 %v948_v32  ;;  %v1129_v8 = vunpack.c.l.s8.bf16 %v791_v20  ;;  %v1131_v32 = vunpack.c.l.s8.bf16 %v793_v25  ;;  %v1106_v36 = vunpack.c.h.s8.bf16 %v768_v31  ;;  %v1080_v42 = vunpack.c.l.s8.bf16 %v768_v31  ;;  %v848_v31 = vld [vmem:[%s2982_s20 + $0x618] sm:$0xff] }
 0x2f9   : > { %1490 = vmatprep.subr.bf16.mxu1 %v950_v35  ;;  %v765_v35 = vld [vmem:[%s2982_s20 + $0x380] sm:$0xff]  ;;  %v900_v20 = vunpack.c.h.s8.bf16 %v666_v16 }
 0x2fb   : > { %1450 = vmatpush1.bf16.msra.mxu0 %v947_v38  ;;  %v767_v38 = vld [vmem:[%s2982_s20 + $0x390] sm:$0xff] }
 0x2fc   : > { %1491 = vmatpush1.bf16.msra.mxu1 %v949_v39  ;;  %1451 = vmatprep.subr.bf16.mxu0 %v922_v40  ;;  %v1103_v39 = vunpack.c.h.s8.bf16 %v765_v35  ;;  %v1105_v40 = vunpack.c.h.s8.bf16 %v767_v38 }
 0x2fd   : > { %1492 = vmatprep.subr.bf16.mxu1 %v924_v41  ;;  %v1078_v41 = vunpack.c.l.s8.bf16 %v766_v30 }
 0x2ff   : > { %1452 = vmatpush1.bf16.msra.mxu0 %v921_v44  ;;  %v746_v44 = vld [vmem:[%s2982_s20 + $0x2e8] sm:$0xff] }
 0x300   : > { %1493 = vmatpush1.bf16.msra.mxu1 %v923_v45  ;;  %1453 = vmatprep.subr.bf16.mxu0 %v896_v46  ;;  %v1077_v45 = vunpack.c.l.s8.bf16 %v765_v35  ;;  %v1079_v46 = vunpack.c.l.s8.bf16 %v767_v38  ;;  %v1058_v49 = vunpack.c.h.s8.bf16 %v746_v44  ;;  %v1032_v55 = vunpack.c.l.s8.bf16 %v746_v44  ;;  %v822_v44 = vld [vmem:[%s2982_s20 + $0x548] sm:$0xff] }
 0x301   : > { %1494 = vmatprep.subr.bf16.mxu1 %v898_v48  ;;  %v743_v48 = vld [vmem:[%s2982_s20 + $0x2d0] sm:$0xff]  ;;  %v1264_v35 = vunpack.c.h.s8.bf16 %v848_v31 }
 0x303   : > { %1454 = vmatpush1.bf16.msra.mxu0 %v895_v50  ;;  %v745_v50 = vld [vmem:[%s2982_s20 + $0x2e0] sm:$0xff] }
 0x304   : > { %1495 = vmatpush1.bf16.msra.mxu1 %v897_v51  ;;  %1455 = vmatprep.subr.bf16.mxu0 %v870_v52  ;;  %v1055_v51 = vunpack.c.h.s8.bf16 %v743_v48  ;;  %v1057_v52 = vunpack.c.h.s8.bf16 %v745_v50 }
 0x305   : > { %1496 = vmatprep.subr.bf16.mxu1 %v872_v53  ;;  %v1030_v53 = vunpack.c.l.s8.bf16 %v744_v43 }
 0x307   : > { %1456 = vmatpush1.bf16.msra.mxu0 %v869_v56  ;;  %v720_v56 = vld [vmem:[%s2982_s20 + $0x218] sm:$0xff] }
 0x308   : > { %1497 = vmatpush1.bf16.msra.mxu1 %v871_v57  ;;  %1457 = vmatprep.subr.bf16.mxu0 %v1260_v58  ;;  %v1029_v57 = vunpack.c.l.s8.bf16 %v743_v48  ;;  %v1031_v58 = vunpack.c.l.s8.bf16 %v745_v50  ;;  %v1006_v61 = vunpack.c.h.s8.bf16 %v720_v56  ;;  %v980_v2 = vunpack.c.l.s8.bf16 %v720_v56  ;;  %v796_v56 = vld [vmem:[%s2982_s20 + $0x478] sm:$0xff] }
 0x309   : > { %1498 = vmatprep.subr.bf16.mxu1 %v1262_v60  ;;  %v717_v60 = vld [vmem:[%s2982_s20 + $0x200] sm:$0xff]  ;;  %v1212_v48 = vunpack.c.h.s8.bf16 %v822_v44 }
 0x30b   : > { %1458 = vmatpush2.bf16.msra.mxu0 %v1259_v62  ;;  %v719_v62 = vld [vmem:[%s2982_s20 + $0x210] sm:$0xff] }
 0x30c   : > { %1499 = vmatpush2.bf16.msra.mxu1 %v1261_v63  ;;  %1459 = vmatprep.subr.bf16.mxu0 %v1234_v0  ;;  %v1003_v63 = vunpack.c.h.s8.bf16 %v717_v60  ;;  %v1005_v0 = vunpack.c.h.s8.bf16 %v719_v62 }
 0x30d   : > { %1500 = vmatprep.subr.bf16.mxu1 %v1236_v1  ;;  %v978_v1 = vunpack.c.l.s8.bf16 %v718_v54  ;;  %v1186_v54 = vunpack.c.l.s8.bf16 %v822_v44 }
 0x30f   : > { %1460 = vmatpush2.bf16.msra.mxu0 %v1233_v4  ;;  %v694_v4 = vld [vmem:[%s2982_s20 + $0x148] sm:$0xff] }
 0x310   : > { %1501 = vmatpush2.bf16.msra.mxu1 %v1235_v5  ;;  %1461 = vmatprep.subr.bf16.mxu0 %v1208_v6  ;;  %v977_v5 = vunpack.c.l.s8.bf16 %v717_v60  ;;  %v979_v6 = vunpack.c.l.s8.bf16 %v719_v62  ;;  %v954_v10 = vunpack.c.h.s8.bf16 %v694_v4  ;;  %v928_v15 = vunpack.c.l.s8.bf16 %v694_v4  ;;  %v770_v4 = vld [vmem:[%s2982_s20 + $0x3a8] sm:$0xff] }
 0x311   : > { %1502 = vmatprep.subr.bf16.mxu1 %v1210_v9  ;;  %v691_v9 = vld [vmem:[%s2982_s20 + $0x130] sm:$0xff]  ;;  %v1160_v60 = vunpack.c.h.s8.bf16 %v796_v56 }
 0x313   : > { %1462 = vmatpush2.bf16.msra.mxu0 %v1207_v11  ;;  %v693_v11 = vld [vmem:[%s2982_s20 + $0x140] sm:$0xff] }
 0x314   : > { %1503 = vmatpush2.bf16.msra.mxu1 %v1209_v12  ;;  %1463 = vmatprep.subr.bf16.mxu0 %v1182_v13  ;;  %v951_v12 = vunpack.c.h.s8.bf16 %v691_v9  ;;  %v953_v13 = vunpack.c.h.s8.bf16 %v693_v11 }
 0x315   : > { %1504 = vmatprep.subr.bf16.mxu1 %v1184_v14  ;;  %v926_v14 = vunpack.c.l.s8.bf16 %v692_v3 }
 0x317   : > { %1464 = vmatpush2.bf16.msra.mxu0 %v1181_v17  ;;  %v668_v17 = vld [vmem:[%s2982_s20 + $0x78] sm:$0xff] }
 0x318   : > { %1505 = vmatpush2.bf16.msra.mxu1 %v1183_v18  ;;  %1465 = vmatprep.subr.bf16.mxu0 %v1156_v19  ;;  %v925_v18 = vunpack.c.l.s8.bf16 %v691_v9  ;;  %v927_v19 = vunpack.c.l.s8.bf16 %v693_v11  ;;  %v902_v25 = vunpack.c.h.s8.bf16 %v668_v17  ;;  %v876_v30 = vunpack.c.l.s8.bf16 %v668_v17  ;;  %v748_v17 = vld [vmem:[%s2982_s20 + $0x2f8] sm:$0xff] }
 0x319   : > { %1506 = vmatprep.subr.bf16.mxu1 %v1158_v23  ;;  %v665_v23 = vld [vmem:[%s2982_s20 + $0x60] sm:$0xff]  ;;  %v1108_v9 = vunpack.c.h.s8.bf16 %v770_v4 }
 0x31b   : > { %1466 = vmatpush2.bf16.msra.mxu0 %v1155_v26  ;;  %v667_v26 = vld [vmem:[%s2982_s20 + $0x70] sm:$0xff] }
 0x31c   : > { %1507 = vmatpush2.bf16.msra.mxu1 %v1157_v27  ;;  %1467 = vmatprep.subr.bf16.mxu0 %v1130_v28  ;;  %v899_v27 = vunpack.c.h.s8.bf16 %v665_v23  ;;  %v901_v28 = vunpack.c.h.s8.bf16 %v667_v26 }
 0x31d   : > { %1508 = vmatprep.subr.bf16.mxu1 %v1132_v29  ;;  %v874_v29 = vunpack.c.l.s8.bf16 %v666_v16 }
 0x31f   : > { %1468 = vmatpush2.bf16.msra.mxu0 %v1129_v8  ;;  %v850_v8 = vld [vmem:[%s2982_s20 + $0x628] sm:$0xff] }
 0x320   : > { %1509 = vmatpush2.bf16.msra.mxu1 %v1131_v32  ;;  %1469 = vmatprep.subr.bf16.mxu0 %v1104_v33  ;;  %v873_v32 = vunpack.c.l.s8.bf16 %v665_v23  ;;  %v875_v33 = vunpack.c.l.s8.bf16 %v667_v26  ;;  %v1266_v38 = vunpack.c.h.s8.bf16 %v850_v8  ;;  %v1240_v43 = vunpack.c.l.s8.bf16 %v850_v8  ;;  %v3170_v26 = vld [vmem:[%s2988_s12] sm:$0xff] }
 0x321   : > { %1510 = vmatprep.subr.bf16.mxu1 %v1106_v36  ;;  %v847_v36 = vld [vmem:[%s2982_s20 + $0x610] sm:$0xff]  ;;  %v1821_v8 = vrot.slane %v3170_v26, %v3045_v22 }
 0x323   : > { %1470 = vmatpush2.bf16.msra.mxu0 %v1103_v39  ;;  %v849_v39 = vld [vmem:[%s2982_s20 + $0x620] sm:$0xff] }
 0x324   : > { %1511 = vmatpush2.bf16.msra.mxu1 %v1105_v40  ;;  %1471 = vmatprep.subr.bf16.mxu0 %v1078_v41  ;;  %v1263_v40 = vunpack.c.h.s8.bf16 %v847_v36  ;;  %v1265_v41 = vunpack.c.h.s8.bf16 %v849_v39 }
 0x325   : > { %1512 = vmatprep.subr.bf16.mxu1 %v1080_v42  ;;  %v1238_v42 = vunpack.c.l.s8.bf16 %v848_v31  ;;  %v3178_v31 = vld [vmem:[%s2990_s24] sm:$0xff] }
 0x327   : > { %1472 = vmatpush2.bf16.msra.mxu0 %v1077_v45  ;;  %v824_v45 = vld [vmem:[%s2982_s20 + $0x558] sm:$0xff] }
 0x328   : > { %1513 = vmatpush2.bf16.msra.mxu1 %v1079_v46  ;;  %1523 = vmatprep.subr.bf16.mxu0 %v1056_v47  ;;  %v1237_v46 = vunpack.c.l.s8.bf16 %v847_v36  ;;  %v1239_v47 = vunpack.c.l.s8.bf16 %v849_v39  ;;  %v1214_v50 = vunpack.c.h.s8.bf16 %v824_v45  ;;  %v1985_v36 = vrot.slane %v3178_v31, %v3045_v22 }
 0x329   : > { %1564 = vmatprep.subr.bf16.mxu1 %v1058_v49  ;;  %v821_v49 = vld [vmem:[%s2982_s20 + $0x540] sm:$0xff]  ;;  %v1825_v39 = vrot.slane %v3170_v26, %v3048_v24 }
 0x32a   : > { %1474 = vmatmul.mubr.bf16.vlgmr.msra.gmra.mxu0 %v3056_v37 }
 0x32b   : > { %1515 = vmatmul.mubr.bf16.vlgmr.msra.gmra.mxu1 %v3056_v37  ;;  %1524 = vmatpush1.bf16.msra.mxu0 %v1055_v51  ;;  %v823_v51 = vld [vmem:[%s2982_s20 + $0x550] sm:$0xff] }
 0x32c   : > { %1555 = vmatprep.mubr.bf16.mxu0 %v3054_v34  ;;  %1565 = vmatpush1.bf16.msra.mxu1 %v1057_v52  ;;  %v1211_v52 = vunpack.c.h.s8.bf16 %v821_v49 }
 0x32d   : > { %1596 = vmatprep.mubr.bf16.mxu1 %v3054_v34  ;;  %1525 = vmatprep.subr.bf16.mxu0 %v1030_v53  ;;  %v1213_v53 = vunpack.c.h.s8.bf16 %v823_v51 }
 0x32e   : > { %1566 = vmatprep.subr.bf16.mxu1 %v1032_v55  ;;  %v1188_v55 = vunpack.c.l.s8.bf16 %v824_v45  ;;  %v1989_v45 = vrot.slane %v3178_v31, %v3048_v24 }
 0x32f   : > { %1526 = vmatpush1.bf16.msra.mxu0 %v1029_v57  ;;  %v798_v57 = vld [vmem:[%s2982_s20 + $0x488] sm:$0xff] }
 0x330   : > { %1567 = vmatpush1.bf16.msra.mxu1 %v1031_v58  ;;  %1527 = vmatprep.subr.bf16.mxu0 %v1004_v59  ;;  %v1185_v58 = vunpack.c.l.s8.bf16 %v821_v49  ;;  %v1187_v59 = vunpack.c.l.s8.bf16 %v823_v51  ;;  %v1162_v62 = vunpack.c.h.s8.bf16 %v798_v57  ;;  %v1136_v3 = vunpack.c.l.s8.bf16 %v798_v57  ;;  %v721_v57 = vld [vmem:[%s2982_s20 + $0x220] sm:$0xff] }
 0x331   : > { %1568 = vmatprep.subr.bf16.mxu1 %v1006_v61  ;;  %v795_v61 = vld [vmem:[%s2982_s20 + $0x470] sm:$0xff] }
 0x333   : > { %1528 = vmatpush1.bf16.msra.mxu0 %v1003_v63  ;;  %v797_v63 = vld [vmem:[%s2982_s20 + $0x480] sm:$0xff] }
 0x334   : > { %1569 = vmatpush1.bf16.msra.mxu1 %v1005_v0  ;;  %1529 = vmatprep.subr.bf16.mxu0 %v978_v1  ;;  %v1159_v0 = vunpack.c.h.s8.bf16 %v795_v61  ;;  %v1161_v1 = vunpack.c.h.s8.bf16 %v797_v63 }
 0x335   : > { %1570 = vmatprep.subr.bf16.mxu1 %v980_v2  ;;  %v1134_v2 = vunpack.c.l.s8.bf16 %v796_v56 }
 0x337   : > { %1530 = vmatpush1.bf16.msra.mxu0 %v977_v5  ;;  %v772_v5 = vld [vmem:[%s2982_s20 + $0x3b8] sm:$0xff] }
 0x338   : > { %1571 = vmatpush1.bf16.msra.mxu1 %v979_v6  ;;  %1531 = vmatprep.subr.bf16.mxu0 %v952_v7  ;;  %v1133_v6 = vunpack.c.l.s8.bf16 %v795_v61  ;;  %v1135_v7 = vunpack.c.l.s8.bf16 %v797_v63  ;;  %v1110_v11 = vunpack.c.h.s8.bf16 %v772_v5  ;;  %v1084_v16 = vunpack.c.l.s8.bf16 %v772_v5 }
 0x339   : > { %1572 = vmatprep.subr.bf16.mxu1 %v954_v10  ;;  %v769_v10 = vld [vmem:[%s2982_s20 + $0x3a0] sm:$0xff] }
 0x33b   : > { %1532 = vmatpush1.bf16.msra.mxu0 %v951_v12  ;;  %v771_v12 = vld [vmem:[%s2982_s20 + $0x3b0] sm:$0xff] }
 0x33c   : > { %1573 = vmatpush1.bf16.msra.mxu1 %v953_v13  ;;  %1533 = vmatprep.subr.bf16.mxu0 %v926_v14  ;;  %v1107_v13 = vunpack.c.h.s8.bf16 %v769_v10  ;;  %v1109_v14 = vunpack.c.h.s8.bf16 %v771_v12  ;;  %v1083_v23 = vunpack.c.l.s8.bf16 %v771_v12  ;;  %v981_v12 = vunpack.c.l.s8.bf16 %v721_v57 }
 0x33d   : > { %1574 = vmatprep.subr.bf16.mxu1 %v928_v15  ;;  %v1082_v15 = vunpack.c.l.s8.bf16 %v770_v4 }
 0x33f   : > { %1534 = vmatpush1.bf16.msra.mxu0 %v925_v18  ;;  %v750_v18 = vld [vmem:[%s2982_s20 + $0x308] sm:$0xff] }
 0x340   : > { %1575 = vmatpush1.bf16.msra.mxu1 %v927_v19  ;;  %1535 = vmatprep.subr.bf16.mxu0 %v900_v20  ;;  %v1081_v19 = vunpack.c.l.s8.bf16 %v769_v10  ;;  %v3167_v20 = vsub.s32 2, %v3042_v21  ;;  %v696_v10 = vld [vmem:[%s2982_s20 + $0x158] sm:$0xff] }
 0x341   : > { %1576 = vmatprep.subr.bf16.mxu1 %v902_v25  ;;  %v1060_v25 = vunpack.c.h.s8.bf16 %v748_v17 }
 0x343   : > { %1536 = vmatpush1.bf16.msra.mxu0 %v899_v27  ;;  %v747_v27 = vld [vmem:[%s2982_s20 + $0x2f0] sm:$0xff] }
 0x344   : > { %1577 = vmatpush1.bf16.msra.mxu1 %v901_v28  ;;  %1537 = vmatprep.subr.bf16.mxu0 %v874_v29  ;;  %v1062_v28 = vunpack.c.h.s8.bf16 %v750_v18  ;;  %v749_v29 = vld [vmem:[%s2982_s20 + $0x300] sm:$0xff]  ;;  %v1033_v51 = vunpack.c.l.s8.bf16 %v747_v27 }
 0x345   : > { %1578 = vmatprep.subr.bf16.mxu1 %v876_v30  ;;  %v3175_v30 = vsub.s32 3, %v3042_v21 }
 0x347   : > { %1538 = vmatpush1.bf16.msra.mxu0 %v873_v32  ;;  %v1829_v32 = vrot.slane %v3170_v26, %v3167_v20 }
 0x348   : > { %1579 = vmatpush1.bf16.msra.mxu1 %v875_v33  ;;  %1539 = vmatprep.subr.bf16.mxu0 %v1264_v35  ;;  %v1059_v33 = vunpack.c.h.s8.bf16 %v747_v27  ;;  %v1061_v35 = vunpack.c.h.s8.bf16 %v749_v29  ;;  %v670_v27 = vld [vmem:[%s2982_s20 + $0x88] sm:$0xff] }
 0x349   : > { %1580 = vmatprep.subr.bf16.mxu1 %v1266_v38  ;;  %v1993_v38 = vrot.slane %v3178_v31, %v3167_v20 }
 0x34b   : > { %1540 = vmatpush2.bf16.msra.mxu0 %v1263_v40  ;;  %v1833_v40 = vrot.slane %v3170_v26, %v3175_v30 }
 0x34c   : > { %1581 = vmatpush2.bf16.msra.mxu1 %v1265_v41  ;;  %1541 = vmatprep.subr.bf16.mxu0 %v1238_v42  ;;  %v722_v41 = vld [vmem:[%s2982_s20 + $0x228] sm:$0xff]  ;;  %v724_v42 = vld [vmem:[%s2982_s20 + $0x238] sm:$0xff] }
 0x34d   : > { %1582 = vmatprep.subr.bf16.mxu1 %v1240_v43  ;;  %v1010_v56 = vunpack.c.h.s8.bf16 %v724_v42 }
 0x34f   : > { %1542 = vmatpush2.bf16.msra.mxu0 %v1237_v46  ;;  %v1034_v46 = vunpack.c.l.s8.bf16 %v748_v17  ;;  %v697_v17 = vld [vmem:[%s2982_s20 + $0x160] sm:$0xff] }
 0x350   : > { %1583 = vmatpush2.bf16.msra.mxu1 %v1239_v47  ;;  %1543 = vmatprep.subr.bf16.mxu0 %v1212_v48  ;;  %v1036_v47 = vunpack.c.l.s8.bf16 %v750_v18 }
 0x351   : > { %1584 = vmatprep.subr.bf16.mxu1 %v1214_v50  ;;  %v1997_v50 = vrot.slane %v3178_v31, %v3175_v30 }
 0x353   : > { %1544 = vmatpush2.bf16.msra.mxu0 %v1211_v52 }
 0x354   : > { %1585 = vmatpush2.bf16.msra.mxu1 %v1213_v53  ;;  %1545 = vmatprep.subr.bf16.mxu0 %v1186_v54  ;;  %v1035_v54 = vunpack.c.l.s8.bf16 %v749_v29 }
 0x355   : > { %1586 = vmatprep.subr.bf16.mxu1 %v1188_v55  ;;  %v1008_v55 = vunpack.c.h.s8.bf16 %v722_v41 }
 0x357   : > { %1546 = vmatpush2.bf16.msra.mxu0 %v1185_v58 }
 0x358   : > { %1587 = vmatpush2.bf16.msra.mxu1 %v1187_v59  ;;  %1547 = vmatprep.subr.bf16.mxu0 %v1160_v60 }
 0x359   : > { %1588 = vmatprep.subr.bf16.mxu1 %v1162_v62  ;;  %v723_v62 = vld [vmem:[%s2982_s20 + $0x230] sm:$0xff] }
 0x35b   : > { %1548 = vmatpush2.bf16.msra.mxu0 %v1159_v0 }
 0x35c   : > { %1589 = vmatpush2.bf16.msra.mxu1 %v1161_v1  ;;  %1549 = vmatprep.subr.bf16.mxu0 %v1134_v2 }
 0x35d   : > { %1590 = vmatprep.subr.bf16.mxu1 %v1136_v3  ;;  %v1007_v3 = vunpack.c.h.s8.bf16 %v721_v57 }
 0x35f   : > { %1550 = vmatpush2.bf16.msra.mxu0 %v1133_v6  ;;  %v1009_v6 = vunpack.c.h.s8.bf16 %v723_v62 }
 0x360   : > { %1591 = vmatpush2.bf16.msra.mxu1 %v1135_v7  ;;  %1551 = vmatprep.subr.bf16.mxu0 %v1108_v9  ;;  %v982_v7 = vunpack.c.l.s8.bf16 %v722_v41  ;;  %v984_v9 = vunpack.c.l.s8.bf16 %v724_v42 }
 0x361   : > { %1592 = vmatprep.subr.bf16.mxu1 %v1110_v11  ;;  %v698_v11 = vld [vmem:[%s2982_s20 + $0x168] sm:$0xff] }
 0x363   : > { %1552 = vmatpush2.bf16.msra.mxu0 %v1107_v13  ;;  %v983_v13 = vunpack.c.l.s8.bf16 %v723_v62 }
 0x364   : > { %1593 = vmatpush2.bf16.msra.mxu1 %v1109_v14  ;;  %1553 = vmatprep.subr.bf16.mxu0 %v1082_v15  ;;  %v956_v14 = vunpack.c.h.s8.bf16 %v696_v10  ;;  %v695_v15 = vld [vmem:[%s2982_s20 + $0x150] sm:$0xff] }
 0x365   : > { %1594 = vmatprep.subr.bf16.mxu1 %v1084_v16  ;;  %v958_v16 = vunpack.c.h.s8.bf16 %v698_v11  ;;  %v955_v18 = vunpack.c.h.s8.bf16 %v695_v15  ;;  %v929_v29 = vunpack.c.l.s8.bf16 %v695_v15 }
 0x367   : > { %1554 = vmatpush2.bf16.msra.mxu0 %v1081_v19  ;;  %v957_v19 = vunpack.c.h.s8.bf16 %v697_v17 }
 0x368   : > { %1595 = vmatpush2.bf16.msra.mxu1 %v1083_v23  ;;  %1605 = vmatprep.subr.bf16.mxu0 %v1060_v25  ;;  %v930_v23 = vunpack.c.l.s8.bf16 %v696_v10  ;;  %v932_v25 = vunpack.c.l.s8.bf16 %v698_v11 }
 0x369   : > { %1646 = vmatprep.subr.bf16.mxu1 %v1062_v28  ;;  %v672_v28 = vld [vmem:[%s2982_s20 + $0x98] sm:$0xff] }
 0x36a   : > { %1556 = vmatmul.mubr.bf16.vlgmr.msra.gmra.mxu0 %v3056_v37  ;;  %v1311_v43 = vpop.f32.mrf.mxu0  ;;  %v1352_v44 = vpop.f32.mrf.mxu1 }
 0x36b   : > { %1597 = vmatmul.mubr.bf16.vlgmr.msra.gmra.mxu1 %v3056_v37  ;;  %v1948_v48 = vmul.f32 %v1821_v8, %v1311_v43  ;;  %v1950_v49 = vmul.f32 %v1829_v32, %v1352_v44  ;;  %1606 = vmatpush1.bf16.msra.mxu0 %v1059_v33  ;;  %v931_v32 = vunpack.c.l.s8.bf16 %v697_v17  ;;  %v904_v33 = vunpack.c.h.s8.bf16 %v670_v27 }
 0x36c   : > { %1637 = vmatprep.mubr.bf16.mxu0 %v3054_v34  ;;  %1647 = vmatpush1.bf16.msra.mxu1 %v1061_v35  ;;  %v1313_v52 = vpop.f32.mrf.mxu0  ;;  %v1354_v53 = vpop.f32.mrf.mxu1  ;;  %v669_v35 = vld [vmem:[%s2982_s20 + $0x80] sm:$0xff]  ;;  %v878_v44 = vunpack.c.l.s8.bf16 %v670_v27 }
 0x36d   : > { %v2112_v58 = vadd.f32 %v1985_v36, %v1948_v48  ;;  %v2114_v59 = vadd.f32 %v1993_v38, %v1950_v49  ;;  %1678 = vmatprep.mubr.bf16.mxu1 %v3054_v34  ;;  %v1949_v60 = vmul.f32 %v1825_v39, %v1313_v52  ;;  %v1951_v61 = vmul.f32 %v1833_v40, %v1354_v53  ;;  %v671_v39 = vld [vmem:[%s2982_s20 + $0x90] sm:$0xff]  ;;  %v853_v53 = vld [vmem:[%s2982_s20 + $0x640] sm:$0xff] }
 0x36e   : > { %1607 = vmatprep.subr.bf16.mxu0 %v1034_v46  ;;  %1648 = vmatprep.subr.bf16.mxu1 %v1036_v47  ;;  %v1315_v63 = vpop.f32.mrf.mxu0  ;;  %v1356_v0 = vpop.f32.mrf.mxu1  ;;  %v906_v38 = vunpack.c.h.s8.bf16 %v672_v28  ;;  %v903_v42 = vunpack.c.h.s8.bf16 %v669_v35  ;;  %v905_v43 = vunpack.c.h.s8.bf16 %v671_v39  ;;  %v852_v46 = vld [vmem:[%s2982_s20 + $0x638] sm:$0xff]  ;;  %v854_v47 = vld [vmem:[%s2982_s20 + $0x648] sm:$0xff]  ;;  %v877_v48 = vunpack.c.l.s8.bf16 %v669_v35 }
 0x36f   : > { %2465 = vtanh.f32 %v2112_v58  ;;  %v2113_v1 = vadd.f32 %v1989_v45, %v1949_v60  ;;  %v2115_v2 = vadd.f32 %v1997_v50, %v1951_v61  ;;  %1608 = vmatpush1.bf16.msra.mxu0 %v1033_v51  ;;  %v880_v45 = vunpack.c.l.s8.bf16 %v672_v28  ;;  %v851_v51 = vld [vmem:[%s2982_s20 + $0x630] sm:$0xff]  ;;  %v826_v58 = vld [vmem:[%s2982_s20 + $0x568] sm:$0xff]  ;;  %v825_v63 = vld [vmem:[%s2982_s20 + $0x560] sm:$0xff] }
 0x370   : > { %2467 = vtanh.f32 %v2114_v59  ;;  %1649 = vmatpush1.bf16.msra.mxu1 %v1035_v54  ;;  %v1316_v4 = vpop.f32.mrf.mxu0  ;;  %v1357_v5 = vpop.f32.mrf.mxu1  ;;  %1609 = vmatprep.subr.bf16.mxu0 %v1008_v55  ;;  %v879_v49 = vunpack.c.l.s8.bf16 %v671_v39  ;;  %v1268_v50 = vunpack.c.h.s8.bf16 %v852_v46  ;;  %v1270_v52 = vunpack.c.h.s8.bf16 %v854_v47  ;;  %v828_v59 = vld [vmem:[%s2982_s20 + $0x578] sm:$0xff] }
 0x371   : > { %2469 = vtanh.f32 %v2113_v1  ;;  %1650 = vmatprep.subr.bf16.mxu1 %v1010_v56  ;;  %v1267_v54 = vunpack.c.h.s8.bf16 %v851_v51  ;;  %v1269_v55 = vunpack.c.h.s8.bf16 %v853_v53  ;;  %v1242_v56 = vunpack.c.l.s8.bf16 %v852_v46  ;;  %v827_v1 = vld [vmem:[%s2982_s20 + $0x570] sm:$0xff]  ;;  %v752_v39 = vld [vmem:[%s2982_s20 + $0x318] sm:$0xff] }
 0x372   : > { %2471 = vtanh.f32 %v2115_v2  ;;  %v1244_v57 = vunpack.c.l.s8.bf16 %v854_v47  ;;  %v1241_v60 = vunpack.c.l.s8.bf16 %v851_v51  ;;  %v1243_v61 = vunpack.c.l.s8.bf16 %v853_v53  ;;  %v751_v46 = vld [vmem:[%s2982_s20 + $0x310] sm:$0xff] }
 0x373   : > { %1610 = vmatpush1.bf16.msra.mxu0 %v1007_v3  ;;  %v1216_v62 = vunpack.c.h.s8.bf16 %v826_v58  ;;  %v1218_v0 = vunpack.c.h.s8.bf16 %v828_v59  ;;  %v1215_v2 = vunpack.c.h.s8.bf16 %v825_v63  ;;  %v1217_v3 = vunpack.c.h.s8.bf16 %v827_v1 }
 0x374   : > { %1651 = vmatpush1.bf16.msra.mxu1 %v1009_v6  ;;  %1611 = vmatprep.subr.bf16.mxu0 %v982_v7  ;;  %v1190_v4 = vunpack.c.l.s8.bf16 %v826_v58  ;;  %v1192_v5 = vunpack.c.l.s8.bf16 %v828_v59  ;;  %v800_v6 = vld [vmem:[%s2982_s20 + $0x498] sm:$0xff]  ;;  %v802_v7 = vld [vmem:[%s2982_s20 + $0x4a8] sm:$0xff]  ;;  %v1191_v10 = vunpack.c.l.s8.bf16 %v827_v1  ;;  %v1063_v53 = vunpack.c.h.s8.bf16 %v751_v46 }
 0x375   : > { %1652 = vmatprep.subr.bf16.mxu1 %v984_v9  ;;  %v1189_v9 = vunpack.c.l.s8.bf16 %v825_v63  ;;  %v1164_v11 = vunpack.c.h.s8.bf16 %v800_v6  ;;  %v1138_v17 = vunpack.c.l.s8.bf16 %v800_v6  ;;  %v726_v58 = vld [vmem:[%s2982_s20 + $0x248] sm:$0xff]  ;;  %v728_v59 = vld [vmem:[%s2982_s20 + $0x258] sm:$0xff]  ;;  %v1038_v63 = vunpack.c.l.s8.bf16 %v752_v39 }
 0x377   : > { %1612 = vmatpush1.bf16.msra.mxu0 %v981_v12  ;;  %v799_v12 = vld [vmem:[%s2982_s20 + $0x490] sm:$0xff] }
 0x378   : > { %1653 = vmatpush1.bf16.msra.mxu1 %v983_v13  ;;  %1613 = vmatprep.subr.bf16.mxu0 %v956_v14  ;;  %v1166_v13 = vunpack.c.h.s8.bf16 %v802_v7  ;;  %v801_v14 = vld [vmem:[%s2982_s20 + $0x4a0] sm:$0xff]  ;;  %v1163_v15 = vunpack.c.h.s8.bf16 %v799_v12 }
 0x379   : > { %1654 = vmatprep.subr.bf16.mxu1 %v958_v16  ;;  %v1165_v16 = vunpack.c.h.s8.bf16 %v801_v14  ;;  %v1139_v27 = vunpack.c.l.s8.bf16 %v801_v14 }
 0x37b   : > { %1614 = vmatpush1.bf16.msra.mxu0 %v955_v18  ;;  %v1140_v18 = vunpack.c.l.s8.bf16 %v802_v7  ;;  %v1012_v7 = vunpack.c.h.s8.bf16 %v726_v58 }
 0x37c   : > { %v2466_v8 = vpop.eup %2465  ;;  %1655 = vmatpush1.bf16.msra.mxu1 %v957_v19  ;;  %1615 = vmatprep.subr.bf16.mxu0 %v930_v23  ;;  %v774_v19 = vld [vmem:[%s2982_s20 + $0x3c8] sm:$0xff]  ;;  %v776_v23 = vld [vmem:[%s2982_s20 + $0x3d8] sm:$0xff] }
 0x37d   : > { %v2468_v36 = vpop.eup %2467  ;;  %2164 = vst [vmem:[%s3223_s21] sm:$0xff] %v2466_v8  ;;  %1656 = vmatprep.subr.bf16.mxu1 %v932_v25  ;;  %v1137_v25 = vunpack.c.l.s8.bf16 %v799_v12  ;;  %v1112_v28 = vunpack.c.h.s8.bf16 %v774_v19  ;;  %v1114_v8 = vunpack.c.h.s8.bf16 %v776_v23 }
 0x37e   : > { %v2470_v40 = vpop.eup %2469  ;;  %2166 = vst [vmem:[%s3223_s21 + $0x10] sm:$0xff] %v2468_v36  ;;  %v1086_v36 = vunpack.c.l.s8.bf16 %v774_v19 }
 0x37f   : > { %v2472_v41 = vpop.eup %2471  ;;  %2165 = vst [vmem:[%s3223_s21 + $0x8] sm:$0xff] %v2470_v40  ;;  %1616 = vmatpush1.bf16.msra.mxu0 %v929_v29  ;;  %v773_v29 = vld [vmem:[%s2982_s20 + $0x3c0] sm:$0xff]  ;;  %v754_v40 = vld [vmem:[%s2982_s20 + $0x328] sm:$0xff] }
 0x380   : > { %2167 = vst [vmem:[%s3223_s21 + $0x18] sm:$0xff] %v2472_v41  ;;  %1657 = vmatpush1.bf16.msra.mxu1 %v931_v32  ;;  %1617 = vmatprep.subr.bf16.mxu0 %v904_v33  ;;  %v775_v32 = vld [vmem:[%s2982_s20 + $0x3d0] sm:$0xff]  ;;  %v1111_v33 = vunpack.c.h.s8.bf16 %v773_v29  ;;  %v1085_v41 = vunpack.c.l.s8.bf16 %v773_v29  ;;  %v1066_v47 = vunpack.c.h.s8.bf16 %v754_v40  ;;  %v988_v29 = vunpack.c.l.s8.bf16 %v728_v59 }
 0x381   : > { %1658 = vmatprep.subr.bf16.mxu1 %v906_v38  ;;  %v1113_v35 = vunpack.c.h.s8.bf16 %v775_v32  ;;  %v1088_v38 = vunpack.c.l.s8.bf16 %v776_v23 }
 0x383   : > { %1618 = vmatpush1.bf16.msra.mxu0 %v903_v42  ;;  %v3251_v42 = vsub.s32 4, %v3042_v21 }
 0x384   : > { %1659 = vmatpush1.bf16.msra.mxu1 %v905_v43  ;;  %1619 = vmatprep.subr.bf16.mxu0 %v878_v44  ;;  %v3254_v43 = vsub.s32 6, %v3042_v21  ;;  %v1087_v44 = vunpack.c.l.s8.bf16 %v775_v32  ;;  %v702_v32 = vld [vmem:[%s2982_s20 + $0x188] sm:$0xff] }
 0x385   : > { %1660 = vmatprep.subr.bf16.mxu1 %v880_v45  ;;  %v1064_v45 = vunpack.c.h.s8.bf16 %v752_v39  ;;  %v1837_v51 = vrot.slane %v3170_v26, %v3251_v42  ;;  %v962_v39 = vunpack.c.h.s8.bf16 %v702_v32 }
 0x387   : > { %1620 = vmatpush1.bf16.msra.mxu0 %v877_v48  ;;  %v753_v48 = vld [vmem:[%s2982_s20 + $0x320] sm:$0xff] }
 0x388   : > { %1661 = vmatpush1.bf16.msra.mxu1 %v879_v49  ;;  %1621 = vmatprep.subr.bf16.mxu0 %v1268_v50  ;;  %v3259_v49 = vsub.s32 5, %v3042_v21  ;;  %v3262_v50 = vsub.s32 7, %v3042_v21  ;;  %v1039_v6 = vunpack.c.l.s8.bf16 %v753_v48 }
 0x389   : > { %1662 = vmatprep.subr.bf16.mxu1 %v1270_v52  ;;  %v1845_v52 = vrot.slane %v3170_v26, %v3254_v43 }
 0x38a   : > { %v1841_v21 = vrot.slane %v3170_v26, %v3259_v49 }
 0x38b   : > { %1622 = vmatpush2.bf16.msra.mxu0 %v1267_v54  ;;  %v1065_v54 = vunpack.c.h.s8.bf16 %v753_v48  ;;  %v676_v48 = vld [vmem:[%s2982_s20 + $0xb8] sm:$0xff] }
 0x38c   : > { %1663 = vmatpush2.bf16.msra.mxu1 %v1269_v55  ;;  %1623 = vmatprep.subr.bf16.mxu0 %v1242_v56  ;;  %v2001_v55 = vrot.slane %v3178_v31, %v3251_v42  ;;  %v2009_v56 = vrot.slane %v3178_v31, %v3254_v43 }
 0x38d   : > { %1664 = vmatprep.subr.bf16.mxu1 %v1244_v57  ;;  %v1849_v57 = vrot.slane %v3170_v26, %v3262_v50  ;;  %v2013_v26 = vrot.slane %v3178_v31, %v3262_v50 }
 0x38f   : > { %1624 = vmatpush2.bf16.msra.mxu0 %v1241_v60 }
 0x390   : > { %1665 = vmatpush2.bf16.msra.mxu1 %v1243_v61  ;;  %1625 = vmatprep.subr.bf16.mxu0 %v1216_v62  ;;  %v2005_v62 = vrot.slane %v3178_v31, %v3259_v49 }
 0x391   : > { %1666 = vmatprep.subr.bf16.mxu1 %v1218_v0  ;;  %v1040_v0 = vunpack.c.l.s8.bf16 %v754_v40  ;;  %v701_v40 = vld [vmem:[%s2982_s20 + $0x180] sm:$0xff] }
 0x393   : > { %1626 = vmatpush2.bf16.msra.mxu0 %v1215_v2 }
 0x394   : > { %1667 = vmatpush2.bf16.msra.mxu1 %v1217_v3  ;;  %1627 = vmatprep.subr.bf16.mxu0 %v1190_v4  ;;  %v1037_v3 = vunpack.c.l.s8.bf16 %v751_v46  ;;  %v936_v46 = vunpack.c.l.s8.bf16 %v702_v32 }
 0x395   : > { %1668 = vmatprep.subr.bf16.mxu1 %v1192_v5 }
 0x397   : > { %1628 = vmatpush2.bf16.msra.mxu0 %v1189_v9  ;;  %v1014_v9 = vunpack.c.h.s8.bf16 %v728_v59 }
 0x398   : > { %1669 = vmatpush2.bf16.msra.mxu1 %v1191_v10  ;;  %1629 = vmatprep.subr.bf16.mxu0 %v1164_v11  ;;  %v725_v10 = vld [vmem:[%s2982_s20 + $0x240] sm:$0xff] }
 0x399   : > { %1670 = vmatprep.subr.bf16.mxu1 %v1166_v13  ;;  %v1011_v19 = vunpack.c.h.s8.bf16 %v725_v10 }
 0x39b   : > { %1630 = vmatpush2.bf16.msra.mxu0 %v1163_v15  ;;  %v727_v15 = vld [vmem:[%s2982_s20 + $0x250] sm:$0xff] }
 0x39c   : > { %1671 = vmatpush2.bf16.msra.mxu1 %v1165_v16  ;;  %1631 = vmatprep.subr.bf16.mxu0 %v1138_v17 }
 0x39d   : > { %1672 = vmatprep.subr.bf16.mxu1 %v1140_v18 }
 0x39f   : > { %1632 = vmatpush2.bf16.msra.mxu0 %v1137_v25 }
 0x3a0   : > { %1673 = vmatpush2.bf16.msra.mxu1 %v1139_v27  ;;  %1633 = vmatprep.subr.bf16.mxu0 %v1112_v28  ;;  %v1013_v27 = vunpack.c.h.s8.bf16 %v727_v15  ;;  %v986_v28 = vunpack.c.l.s8.bf16 %v726_v58 }
 0x3a1   : > { %1674 = vmatprep.subr.bf16.mxu1 %v1114_v8  ;;  %v700_v8 = vld [vmem:[%s2982_s20 + $0x178] sm:$0xff] }
 0x3a3   : > { %1634 = vmatpush2.bf16.msra.mxu0 %v1111_v33  ;;  %v985_v33 = vunpack.c.l.s8.bf16 %v725_v10 }
 0x3a4   : > { %1675 = vmatpush2.bf16.msra.mxu1 %v1113_v35  ;;  %1635 = vmatprep.subr.bf16.mxu0 %v1086_v36  ;;  %v987_v35 = vunpack.c.l.s8.bf16 %v727_v15  ;;  %v960_v36 = vunpack.c.h.s8.bf16 %v700_v8 }
 0x3a5   : > { %1676 = vmatprep.subr.bf16.mxu1 %v1088_v38  ;;  %v699_v38 = vld [vmem:[%s2982_s20 + $0x170] sm:$0xff] }
 0x3a7   : > { %1636 = vmatpush2.bf16.msra.mxu0 %v1085_v41  ;;  %v959_v41 = vunpack.c.h.s8.bf16 %v699_v38 }
 0x3a8   : > { %1677 = vmatpush2.bf16.msra.mxu1 %v1087_v44  ;;  %1687 = vmatprep.subr.bf16.mxu0 %v1064_v45  ;;  %v961_v44 = vunpack.c.h.s8.bf16 %v701_v40  ;;  %v934_v45 = vunpack.c.l.s8.bf16 %v700_v8 }
 0x3a9   : > { %1728 = vmatprep.subr.bf16.mxu1 %v1066_v47  ;;  %v674_v47 = vld [vmem:[%s2982_s20 + $0xa8] sm:$0xff] }
 0x3aa   : > { %v1393_v60 = vpop.f32.mrf.mxu0  ;;  %v1434_v61 = vpop.f32.mrf.mxu1  ;;  %1638 = vmatmul.mubr.bf16.vlgmr.msra.gmra.mxu0 %v3056_v37 }
 0x3ab   : > { %v1952_v1 = vmul.f32 %v1837_v51, %v1393_v60  ;;  %v1954_v2 = vmul.f32 %v1845_v52, %v1434_v61  ;;  %1679 = vmatmul.mubr.bf16.vlgmr.msra.gmra.mxu1 %v3056_v37  ;;  %1688 = vmatpush1.bf16.msra.mxu0 %v1063_v53  ;;  %v933_v51 = vunpack.c.l.s8.bf16 %v699_v38  ;;  %v935_v53 = vunpack.c.l.s8.bf16 %v701_v40  ;;  %v805_v38 = vld [vmem:[%s2982_s20 + $0x4c0] sm:$0xff] }
 0x3ac   : > { %1719 = vmatprep.mubr.bf16.mxu0 %v3054_v34  ;;  %1729 = vmatpush1.bf16.msra.mxu1 %v1065_v54  ;;  %v1395_v4 = vpop.f32.mrf.mxu0  ;;  %v1436_v5 = vpop.f32.mrf.mxu1  ;;  %v908_v54 = vunpack.c.h.s8.bf16 %v674_v47  ;;  %v1169_v40 = vunpack.c.h.s8.bf16 %v805_v38 }
 0x3ad   : > { %v2116_v11 = vadd.f32 %v2001_v55, %v1952_v1  ;;  %v2118_v12 = vadd.f32 %v2009_v56, %v1954_v2  ;;  %1760 = vmatprep.mubr.bf16.mxu1 %v3054_v34  ;;  %v1953_v13 = vmul.f32 %v1841_v21, %v1395_v4  ;;  %v1955_v14 = vmul.f32 %v1849_v57, %v1436_v5  ;;  %v673_v55 = vld [vmem:[%s2982_s20 + $0xa0] sm:$0xff]  ;;  %v675_v57 = vld [vmem:[%s2982_s20 + $0xb0] sm:$0xff]  ;;  %v858_v1 = vld [vmem:[%s2982_s20 + $0x668] sm:$0xff] }
 0x3ae   : > { %v1397_v16 = vpop.f32.mrf.mxu0  ;;  %v1438_v17 = vpop.f32.mrf.mxu1  ;;  %1689 = vmatprep.subr.bf16.mxu0 %v1038_v63  ;;  %1730 = vmatprep.subr.bf16.mxu1 %v1040_v0  ;;  %v910_v21 = vunpack.c.h.s8.bf16 %v676_v48  ;;  %v907_v60 = vunpack.c.h.s8.bf16 %v673_v55  ;;  %v909_v61 = vunpack.c.h.s8.bf16 %v675_v57  ;;  %v884_v63 = vunpack.c.l.s8.bf16 %v676_v48  ;;  %v856_v0 = vld [vmem:[%s2982_s20 + $0x658] sm:$0xff]  ;;  %v855_v4 = vld [vmem:[%s2982_s20 + $0x650] sm:$0xff] }
 0x3af   : > { %2473 = vtanh.f32 %v2116_v11  ;;  %v2117_v31 = vadd.f32 %v2005_v62, %v1953_v13  ;;  %v2119_v18 = vadd.f32 %v2013_v26, %v1955_v14  ;;  %1690 = vmatpush1.bf16.msra.mxu0 %v1037_v3  ;;  %v882_v62 = vunpack.c.l.s8.bf16 %v674_v47  ;;  %v832_v13 = vld [vmem:[%s2982_s20 + $0x598] sm:$0xff]  ;;  %v829_v17 = vld [vmem:[%s2982_s20 + $0x580] sm:$0xff] }
 0x3b0   : > { %2475 = vtanh.f32 %v2118_v12  ;;  %1731 = vmatpush1.bf16.msra.mxu1 %v1039_v6  ;;  %v1398_v23 = vpop.f32.mrf.mxu0  ;;  %v1439_v25 = vpop.f32.mrf.mxu1  ;;  %1691 = vmatprep.subr.bf16.mxu0 %v1012_v7  ;;  %v881_v2 = vunpack.c.l.s8.bf16 %v673_v55  ;;  %v883_v26 = vunpack.c.l.s8.bf16 %v675_v57  ;;  %v1272_v3 = vunpack.c.h.s8.bf16 %v856_v0  ;;  %v857_v6 = vld [vmem:[%s2982_s20 + $0x660] sm:$0xff]  ;;  %v830_v12 = vld [vmem:[%s2982_s20 + $0x588] sm:$0xff] }
 0x3b1   : > { %2477 = vtanh.f32 %v2117_v31  ;;  %1732 = vmatprep.subr.bf16.mxu1 %v1014_v9  ;;  %v1274_v5 = vunpack.c.h.s8.bf16 %v858_v1  ;;  %v1271_v7 = vunpack.c.h.s8.bf16 %v855_v4  ;;  %v1273_v9 = vunpack.c.h.s8.bf16 %v857_v6 }
 0x3b2   : > { %2479 = vtanh.f32 %v2119_v18  ;;  %v1246_v10 = vunpack.c.l.s8.bf16 %v856_v0  ;;  %v1248_v11 = vunpack.c.l.s8.bf16 %v858_v1  ;;  %v1245_v14 = vunpack.c.l.s8.bf16 %v855_v4  ;;  %v831_v18 = vld [vmem:[%s2982_s20 + $0x590] sm:$0xff] }
 0x3b3   : > { %1692 = vmatpush1.bf16.msra.mxu0 %v1011_v19  ;;  %v1247_v15 = vunpack.c.l.s8.bf16 %v857_v6  ;;  %v1220_v16 = vunpack.c.h.s8.bf16 %v830_v12  ;;  %v1222_v31 = vunpack.c.h.s8.bf16 %v832_v13  ;;  %v1219_v19 = vunpack.c.h.s8.bf16 %v829_v17  ;;  %v3322_v0 = vld [vmem:[%s2990_s24 + $0x8] sm:$0xff]  ;;  %v730_v6 = vld [vmem:[%s2982_s20 + $0x268] sm:$0xff] }
 0x3b4   : > { %1733 = vmatpush1.bf16.msra.mxu1 %v1013_v27  ;;  %1693 = vmatprep.subr.bf16.mxu0 %v986_v28  ;;  %v1221_v23 = vunpack.c.h.s8.bf16 %v831_v18  ;;  %v1194_v25 = vunpack.c.l.s8.bf16 %v830_v12  ;;  %v1196_v27 = vunpack.c.l.s8.bf16 %v832_v13  ;;  %v804_v28 = vld [vmem:[%s2982_s20 + $0x4b8] sm:$0xff]  ;;  %v1193_v8 = vunpack.c.l.s8.bf16 %v829_v17 }
 0x3b5   : > { %1734 = vmatprep.subr.bf16.mxu1 %v988_v29  ;;  %v806_v29 = vld [vmem:[%s2982_s20 + $0x4c8] sm:$0xff]  ;;  %v1195_v32 = vunpack.c.l.s8.bf16 %v831_v18  ;;  %v1143_v48 = vunpack.c.l.s8.bf16 %v805_v38  ;;  %v2017_v4 = vrot.slane %v3322_v0, %v3045_v22  ;;  %v2021_v13 = vrot.slane %v3322_v0, %v3048_v24  ;;  %v729_v18 = vld [vmem:[%s2982_s20 + $0x260] sm:$0xff] }
 0x3b6   : > { %v2029_v17 = vrot.slane %v3322_v0, %v3175_v30 }
 0x3b7   : > { %1694 = vmatpush1.bf16.msra.mxu0 %v985_v33  ;;  %v1168_v33 = vunpack.c.h.s8.bf16 %v804_v28 }
 0x3b8   : > { %1735 = vmatpush1.bf16.msra.mxu1 %v987_v35  ;;  %1695 = vmatprep.subr.bf16.mxu0 %v960_v36  ;;  %v803_v35 = vld [vmem:[%s2982_s20 + $0x4b0] sm:$0xff]  ;;  %v1170_v36 = vunpack.c.h.s8.bf16 %v806_v29 }
 0x3b9   : > { %1736 = vmatprep.subr.bf16.mxu1 %v962_v39  ;;  %v1167_v39 = vunpack.c.h.s8.bf16 %v803_v35  ;;  %v1141_v47 = vunpack.c.l.s8.bf16 %v803_v35 }
 0x3bb   : > { %1696 = vmatpush1.bf16.msra.mxu0 %v959_v41  ;;  %v1142_v41 = vunpack.c.l.s8.bf16 %v804_v28 }
 0x3bc   : > { %v2474_v52 = vpop.eup %2473  ;;  %1737 = vmatpush1.bf16.msra.mxu1 %v961_v44  ;;  %1697 = vmatprep.subr.bf16.mxu0 %v934_v45  ;;  %v1144_v44 = vunpack.c.l.s8.bf16 %v806_v29  ;;  %v778_v45 = vld [vmem:[%s2982_s20 + $0x3e8] sm:$0xff] }
 0x3bd   : > { %v2476_v56 = vpop.eup %2475  ;;  %2168 = vst [vmem:[%s3223_s21 + $0x20] sm:$0xff] %v2474_v52  ;;  %1738 = vmatprep.subr.bf16.mxu1 %v936_v46  ;;  %v780_v46 = vld [vmem:[%s2982_s20 + $0x3f8] sm:$0xff]  ;;  %v777_v52 = vld [vmem:[%s2982_s20 + $0x3e0] sm:$0xff] }
 0x3be   : > { %v2478_v58 = vpop.eup %2477  ;;  %2170 = vst [vmem:[%s3223_s21 + $0x30] sm:$0xff] %v2476_v56  ;;  %v1115_v55 = vunpack.c.h.s8.bf16 %v777_v52  ;;  %v1092_v57 = vunpack.c.l.s8.bf16 %v780_v46 }
 0x3bf   : > { %v2480_v59 = vpop.eup %2479  ;;  %2169 = vst [vmem:[%s3223_s21 + $0x28] sm:$0xff] %v2478_v58  ;;  %1698 = vmatpush1.bf16.msra.mxu0 %v933_v51  ;;  %v1116_v51 = vunpack.c.h.s8.bf16 %v778_v45  ;;  %v756_v58 = vld [vmem:[%s2982_s20 + $0x338] sm:$0xff] }
 0x3c0   : > { %2171 = vst [vmem:[%s3223_s21 + $0x38] sm:$0xff] %v2480_v59  ;;  %1739 = vmatpush1.bf16.msra.mxu1 %v935_v53  ;;  %1699 = vmatprep.subr.bf16.mxu0 %v908_v54  ;;  %v1118_v53 = vunpack.c.h.s8.bf16 %v780_v46  ;;  %v779_v54 = vld [vmem:[%s2982_s20 + $0x3f0] sm:$0xff]  ;;  %v1089_v59 = vunpack.c.l.s8.bf16 %v777_v52 }
 0x3c1   : > { %1740 = vmatprep.subr.bf16.mxu1 %v910_v21  ;;  %v1117_v56 = vunpack.c.h.s8.bf16 %v779_v54  ;;  %v1090_v21 = vunpack.c.l.s8.bf16 %v778_v45 }
 0x3c3   : > { %1700 = vmatpush1.bf16.msra.mxu0 %v907_v60  ;;  %v1091_v60 = vunpack.c.l.s8.bf16 %v779_v54 }
 0x3c4   : > { %1741 = vmatpush1.bf16.msra.mxu1 %v909_v61  ;;  %1701 = vmatprep.subr.bf16.mxu0 %v882_v62  ;;  %v3318_v61 = vld [vmem:[%s2988_s12 + $0x8] sm:$0xff]  ;;  %v1068_v62 = vunpack.c.h.s8.bf16 %v756_v58 }
 0x3c5   : > { %1742 = vmatprep.subr.bf16.mxu1 %v884_v63  ;;  %v755_v63 = vld [vmem:[%s2982_s20 + $0x330] sm:$0xff]  ;;  %v1853_v1 = vrot.slane %v3318_v61, %v3045_v22 }
 0x3c7   : > { %1702 = vmatpush1.bf16.msra.mxu0 %v881_v2  ;;  %v1067_v2 = vunpack.c.h.s8.bf16 %v755_v63 }
 0x3c8   : > { %1743 = vmatpush1.bf16.msra.mxu1 %v883_v26  ;;  %1703 = vmatprep.subr.bf16.mxu0 %v1272_v3  ;;  %v1861_v26 = vrot.slane %v3318_v61, %v3167_v20  ;;  %v1042_v3 = vunpack.c.l.s8.bf16 %v756_v58  ;;  %v860_v58 = vld [vmem:[%s2982_s20 + $0x678] sm:$0xff] }
 0x3c9   : > { %1744 = vmatprep.subr.bf16.mxu1 %v1274_v5  ;;  %v1857_v5 = vrot.slane %v3318_v61, %v3048_v24 }
 0x3cb   : > { %1704 = vmatpush2.bf16.msra.mxu0 %v1271_v7 }
 0x3cc   : > { %1745 = vmatpush2.bf16.msra.mxu1 %v1273_v9  ;;  %1705 = vmatprep.subr.bf16.mxu0 %v1246_v10  ;;  %v2025_v9 = vrot.slane %v3322_v0, %v3167_v20  ;;  %v1865_v10 = vrot.slane %v3318_v61, %v3175_v30 }
 0x3cd   : > { %1746 = vmatprep.subr.bf16.mxu1 %v1248_v11 }
 0x3cf   : > { %1706 = vmatpush2.bf16.msra.mxu0 %v1245_v14  ;;  %v1041_v14 = vunpack.c.l.s8.bf16 %v755_v63 }
 0x3d0   : > { %1747 = vmatpush2.bf16.msra.mxu1 %v1247_v15  ;;  %1707 = vmatprep.subr.bf16.mxu0 %v1220_v16 }
 0x3d1   : > { %1748 = vmatprep.subr.bf16.mxu1 %v1222_v31  ;;  %v1016_v31 = vunpack.c.h.s8.bf16 %v730_v6 }
 0x3d3   : > { %1708 = vmatpush2.bf16.msra.mxu0 %v1219_v19 }
 0x3d4   : > { %1749 = vmatpush2.bf16.msra.mxu1 %v1221_v23  ;;  %1709 = vmatprep.subr.bf16.mxu0 %v1194_v25 }
 0x3d5   : > { %1750 = vmatprep.subr.bf16.mxu1 %v1196_v27 }
 0x3d7   : > { %1710 = vmatpush2.bf16.msra.mxu0 %v1193_v8 }
 0x3d8   : > { %1751 = vmatpush2.bf16.msra.mxu1 %v1195_v32  ;;  %1711 = vmatprep.subr.bf16.mxu0 %v1168_v33 }
 0x3d9   : > { %1752 = vmatprep.subr.bf16.mxu1 %v1170_v36  ;;  %v990_v36 = vunpack.c.l.s8.bf16 %v730_v6 }
 0x3db   : > { %1712 = vmatpush2.bf16.msra.mxu0 %v1167_v39  ;;  %v704_v39 = vld [vmem:[%s2982_s20 + $0x198] sm:$0xff] }
 0x3dc   : > { %1753 = vmatpush2.bf16.msra.mxu1 %v1169_v40  ;;  %1713 = vmatprep.subr.bf16.mxu0 %v1142_v41  ;;  %v989_v40 = vunpack.c.l.s8.bf16 %v729_v18  ;;  %v964_v41 = vunpack.c.h.s8.bf16 %v704_v39  ;;  %v938_v46 = vunpack.c.l.s8.bf16 %v704_v39  ;;  %v2045_v39 = vrot.slane %v3322_v0, %v3262_v50 }
 0x3dd   : > { %1754 = vmatprep.subr.bf16.mxu1 %v1144_v44  ;;  %v703_v44 = vld [vmem:[%s2982_s20 + $0x190] sm:$0xff] }
 0x3de   : > { %v963_v45 = vunpack.c.h.s8.bf16 %v703_v44 }
 0x3df   : > { %1714 = vmatpush2.bf16.msra.mxu0 %v1141_v47  ;;  %v678_v47 = vld [vmem:[%s2982_s20 + $0xc8] sm:$0xff] }
 0x3e0   : > { %1755 = vmatpush2.bf16.msra.mxu1 %v1143_v48  ;;  %1715 = vmatprep.subr.bf16.mxu0 %v1116_v51  ;;  %v937_v48 = vunpack.c.l.s8.bf16 %v703_v44  ;;  %v912_v52 = vunpack.c.h.s8.bf16 %v678_v47 }
 0x3e1   : > { %1756 = vmatprep.subr.bf16.mxu1 %v1118_v53  ;;  %v677_v53 = vld [vmem:[%s2982_s20 + $0xc0] sm:$0xff] }
 0x3e3   : > { %1716 = vmatpush2.bf16.msra.mxu0 %v1115_v55 }
 0x3e4   : > { %1757 = vmatpush2.bf16.msra.mxu1 %v1117_v56  ;;  %1717 = vmatprep.subr.bf16.mxu0 %v1090_v21  ;;  %v911_v21 = vunpack.c.h.s8.bf16 %v677_v53 }
 0x3e5   : > { %1758 = vmatprep.subr.bf16.mxu1 %v1092_v57  ;;  %v886_v57 = vunpack.c.l.s8.bf16 %v678_v47 }
 0x3e7   : > { %1718 = vmatpush2.bf16.msra.mxu0 %v1089_v59  ;;  %v885_v59 = vunpack.c.l.s8.bf16 %v677_v53 }
 0x3e8   : > { %1759 = vmatpush2.bf16.msra.mxu1 %v1091_v60  ;;  %1769 = vmatprep.subr.bf16.mxu0 %v1068_v62  ;;  %v1276_v60 = vunpack.c.h.s8.bf16 %v860_v58  ;;  %v859_v62 = vld [vmem:[%s2982_s20 + $0x670] sm:$0xff] }
 0x3e9   : > { %v1275_v63 = vunpack.c.h.s8.bf16 %v859_v62 }
 0x3ea   : > { %v1475_v7 = vpop.f32.mrf.mxu0  ;;  %1720 = vmatmul.mubr.bf16.vlgmr.msra.gmra.mxu0 %v3056_v37 }
 0x3eb   : > { %v1956_v11 = vmul.f32 %v1853_v1, %v1475_v7  ;;  %v1516_v12 = vpop.f32.mrf.mxu1  ;;  %1761 = vmatmul.mubr.bf16.vlgmr.msra.gmra.mxu1 %v3056_v37  ;;  %1770 = vmatpush1.bf16.msra.mxu0 %v1067_v2  ;;  %v1250_v1 = vunpack.c.l.s8.bf16 %v860_v58  ;;  %v834_v2 = vld [vmem:[%s2982_s20 + $0x5a8] sm:$0xff]  ;;  %v808_v7 = vld [vmem:[%s2982_s20 + $0x4d8] sm:$0xff] }
 0x3ec   : > { %v1958_v15 = vmul.f32 %v1861_v26, %v1516_v12  ;;  %1801 = vmatprep.mubr.bf16.mxu0 %v3054_v34  ;;  %v1477_v16 = vpop.f32.mrf.mxu0  ;;  %1771 = vmatprep.subr.bf16.mxu0 %v1042_v3  ;;  %v1015_v34 = vunpack.c.h.s8.bf16 %v729_v18  ;;  %v1249_v26 = vunpack.c.l.s8.bf16 %v859_v62  ;;  %v1224_v3 = vunpack.c.h.s8.bf16 %v834_v2 }
 0x3ed   : > { %v2120_v19 = vadd.f32 %v2017_v4, %v1956_v11  ;;  %v1957_v23 = vmul.f32 %v1857_v5, %v1477_v16  ;;  %v1518_v25 = vpop.f32.mrf.mxu1  ;;  %v833_v4 = vld [vmem:[%s2982_s20 + $0x5a0] sm:$0xff]  ;;  %v1198_v6 = vunpack.c.l.s8.bf16 %v834_v2  ;;  %v807_v11 = vld [vmem:[%s2982_s20 + $0x4d0] sm:$0xff] }
 0x3ee   : > { %v2122_v27 = vadd.f32 %v2025_v9, %v1958_v15  ;;  %v1959_v28 = vmul.f32 %v1865_v10, %v1518_v25  ;;  %v1479_v29 = vpop.f32.mrf.mxu0  ;;  %v1223_v5 = vunpack.c.h.s8.bf16 %v833_v4  ;;  %v1197_v9 = vunpack.c.l.s8.bf16 %v833_v4 }
 0x3ef   : > { %2481 = vtanh.f32 %v2120_v19  ;;  %v2121_v8 = vadd.f32 %v2021_v13, %v1957_v23  ;;  %v1520_v32 = vpop.f32.mrf.mxu1  ;;  %1772 = vmatpush1.bf16.msra.mxu0 %v1041_v14  ;;  %v1172_v10 = vunpack.c.h.s8.bf16 %v808_v7  ;;  %v1171_v12 = vunpack.c.h.s8.bf16 %v807_v11  ;;  %v782_v14 = vld [vmem:[%s2982_s20 + $0x408] sm:$0xff] }
 0x3f0   : > { %2483 = vtanh.f32 %v2122_v27  ;;  %v2123_v33 = vadd.f32 %v2029_v17, %v1959_v28  ;;  %v1480_v35 = vpop.f32.mrf.mxu0  ;;  %1773 = vmatprep.subr.bf16.mxu0 %v1016_v31  ;;  %v1146_v13 = vunpack.c.l.s8.bf16 %v808_v7  ;;  %v1145_v15 = vunpack.c.l.s8.bf16 %v807_v11  ;;  %v781_v17 = vld [vmem:[%s2982_s20 + $0x400] sm:$0xff] }
 0x3f1   : > { %2485 = vtanh.f32 %v2121_v8  ;;  %v1521_v38 = vpop.f32.mrf.mxu1  ;;  %v1120_v16 = vunpack.c.h.s8.bf16 %v782_v14  ;;  %v1119_v31 = vunpack.c.h.s8.bf16 %v781_v17  ;;  %v1094_v18 = vunpack.c.l.s8.bf16 %v782_v14 }
 0x3f2   : > { %2487 = vtanh.f32 %v2123_v33  ;;  %v1093_v19 = vunpack.c.l.s8.bf16 %v781_v17  ;;  %v1869_v23 = vrot.slane %v3318_v61, %v3251_v42  ;;  %v1877_v25 = vrot.slane %v3318_v61, %v3254_v43 }
 0x3f3   : > { %1774 = vmatpush1.bf16.msra.mxu0 %v1015_v34  ;;  %v2033_v27 = vrot.slane %v3322_v0, %v3251_v42  ;;  %v1873_v28 = vrot.slane %v3318_v61, %v3259_v49  ;;  %v2041_v8 = vrot.slane %v3322_v0, %v3254_v43  ;;  %v1881_v32 = vrot.slane %v3318_v61, %v3262_v50 }
 0x3f4   : > { %1775 = vmatprep.subr.bf16.mxu0 %v990_v36  ;;  %v2037_v35 = vrot.slane %v3322_v0, %v3259_v49 }
 0x3f7   : > { %1776 = vmatpush1.bf16.msra.mxu0 %v989_v40 }
 0x3f8   : > { %1777 = vmatprep.subr.bf16.mxu0 %v964_v41 }
 0x3fb   : > { %1778 = vmatpush1.bf16.msra.mxu0 %v963_v45 }
 0x3fc   : > { %v2482_v51 = vpop.eup %2481  ;;  %1779 = vmatprep.subr.bf16.mxu0 %v938_v46 }
 0x3fd   : > { %v2484_v54 = vpop.eup %2483  ;;  %2172 = vst [vmem:[%s3223_s21 + $0x40] sm:$0xff] %v2482_v51 }
 0x3fe   : > { %v2486_v55 = vpop.eup %2485  ;;  %2174 = vst [vmem:[%s3223_s21 + $0x50] sm:$0xff] %v2484_v54 }
 0x3ff   : > { %v2488_v56 = vpop.eup %2487  ;;  %2173 = vst [vmem:[%s3223_s21 + $0x48] sm:$0xff] %v2486_v55  ;;  %1780 = vmatpush1.bf16.msra.mxu0 %v937_v48 }
 0x400   : > { %2175 = vst [vmem:[%s3223_s21 + $0x58] sm:$0xff] %v2488_v56  ;;  %1781 = vmatprep.subr.bf16.mxu0 %v912_v52  ;;  %v1812_v56 = vld [vmem:[%s2988_s12 + $0x10] sm:$0xff] }
 0x401   : > { %v1893_v58 = vrot.slane %v1812_v56, %v3167_v20 }
 0x403   : > { %1782 = vmatpush1.bf16.msra.mxu0 %v911_v21  ;;  %v1976_v21 = vld [vmem:[%s2990_s24 + $0x10] sm:$0xff] }
 0x404   : > { %1783 = vmatprep.subr.bf16.mxu0 %v886_v57  ;;  %v1885_v57 = vrot.slane %v1812_v56, %v3045_v22 }
 0x407   : > { %1784 = vmatpush1.bf16.msra.mxu0 %v885_v59  ;;  %v2049_v59 = vrot.slane %v1976_v21, %v3045_v22 }
 0x408   : > { %1785 = vmatprep.subr.bf16.mxu0 %v1276_v60  ;;  %v1889_v60 = vrot.slane %v1812_v56, %v3048_v24 }
 0x40b   : > { %1786 = vmatpush2.bf16.msra.mxu0 %v1275_v63  ;;  %v2057_v63 = vrot.slane %v1976_v21, %v3167_v20 }
 0x40c   : > { %1787 = vmatprep.subr.bf16.mxu0 %v1250_v1  ;;  %v1897_v1 = vrot.slane %v1812_v56, %v3175_v30 }
 0x40f   : > { %1788 = vmatpush2.bf16.msra.mxu0 %v1249_v26 }
 0x410   : > { %1789 = vmatprep.subr.bf16.mxu0 %v1224_v3  ;;  %v2053_v3 = vrot.slane %v1976_v21, %v3048_v24 }
 0x413   : > { %1790 = vmatpush2.bf16.msra.mxu0 %v1223_v5 }
 0x414   : > { %1791 = vmatprep.subr.bf16.mxu0 %v1198_v6  ;;  %v2061_v6 = vrot.slane %v1976_v21, %v3175_v30 }
 0x417   : > { %1792 = vmatpush2.bf16.msra.mxu0 %v1197_v9 }
 0x418   : > { %1793 = vmatprep.subr.bf16.mxu0 %v1172_v10 }
 0x41b   : > { %1794 = vmatpush2.bf16.msra.mxu0 %v1171_v12 }
 0x41c   : > { %1795 = vmatprep.subr.bf16.mxu0 %v1146_v13 }
 0x41f   : > { %1796 = vmatpush2.bf16.msra.mxu0 %v1145_v15 }
 0x420   : > { %1797 = vmatprep.subr.bf16.mxu0 %v1120_v16 }
 0x423   : > { %1798 = vmatpush2.bf16.msra.mxu0 %v1119_v31 }
 0x424   : > { %1799 = vmatprep.subr.bf16.mxu0 %v1094_v18 }
 0x427   : > { %1800 = vmatpush2.bf16.msra.mxu0 %v1093_v19 }
 0x42a   : > { %v1557_v29 = vpop.f32.mrf.mxu0  ;;  %1802 = vmatmul.mubr.bf16.vlgmr.msra.gmra.mxu0 %v3056_v37 }
 0x42b   : > { %v1960_v34 = vmul.f32 %v1869_v23, %v1557_v29  ;;  %v1598_v33 = vpop.f32.mrf.mxu1  ;;  %v1901_v23 = vrot.slane %v1812_v56, %v3251_v42 }
 0x42c   : > { %v1962_v36 = vmul.f32 %v1877_v25, %v1598_v33  ;;  %v1559_v38 = vpop.f32.mrf.mxu0  ;;  %v1909_v25 = vrot.slane %v1812_v56, %v3254_v43 }
 0x42d   : > { %v2124_v40 = vadd.f32 %v2033_v27, %v1960_v34  ;;  %v1961_v41 = vmul.f32 %v1873_v28, %v1559_v38  ;;  %v1600_v44 = vpop.f32.mrf.mxu1  ;;  %v2065_v27 = vrot.slane %v1976_v21, %v3251_v42  ;;  %v1905_v28 = vrot.slane %v1812_v56, %v3259_v49 }
 0x42e   : > { %v2126_v45 = vadd.f32 %v2041_v8, %v1962_v36  ;;  %v1963_v37 = vmul.f32 %v1881_v32, %v1600_v44  ;;  %v1561_v46 = vpop.f32.mrf.mxu0  ;;  %v2073_v8 = vrot.slane %v1976_v21, %v3254_v43  ;;  %v1913_v32 = vrot.slane %v1812_v56, %v3262_v50 }
 0x42f   : > { %2489 = vtanh.f32 %v2124_v40  ;;  %v2125_v61 = vadd.f32 %v2037_v35, %v1961_v41  ;;  %v1602_v47 = vpop.f32.mrf.mxu1  ;;  %v2069_v35 = vrot.slane %v1976_v21, %v3259_v49 }
 0x430   : > { %2491 = vtanh.f32 %v2126_v45  ;;  %v2127_v48 = vadd.f32 %v2045_v39, %v1963_v37  ;;  %v1562_v51 = vpop.f32.mrf.mxu0  ;;  %v2077_v39 = vrot.slane %v1976_v21, %v3262_v50 }
 0x431   : > { %2493 = vtanh.f32 %v2125_v61  ;;  %v1603_v0 = vpop.f32.mrf.mxu1 }
 0x432   : > { %2495 = vtanh.f32 %v2127_v48 }
 0x43c   : > { %v2490_v52 = vpop.eup %2489 }
 0x43d   : > { %v2492_v53 = vpop.eup %2491  ;;  %2176 = vst [vmem:[%s3223_s21 + $0x60] sm:$0xff] %v2490_v52  ;;  %v1813_v52 = vld [vmem:[%s2988_s12 + $0x18] sm:$0x3] }
 0x43e   : > { %v2494_v54 = vpop.eup %2493  ;;  %2178 = vst [vmem:[%s3223_s21 + $0x70] sm:$0xff] %v2492_v53  ;;  %v1977_v53 = vld [vmem:[%s2990_s24 + $0x18] sm:$0x3]  ;;  %v1921_v56 = vrot.slane %v1813_v52, %v3048_v24 }
 0x43f   : > { %v2496_v55 = vpop.eup %2495  ;;  %2177 = vst [vmem:[%s3223_s21 + $0x68] sm:$0xff] %v2494_v54  ;;  %v1917_v54 = vrot.slane %v1813_v52, %v3045_v22 }
 0x440   : > { %2179 = vst [vmem:[%s3223_s21 + $0x78] sm:$0xff] %v2496_v55  ;;  %v2081_v55 = vrot.slane %v1977_v53, %v3045_v22 }
 0x46a   : > { %v1639_v62 = vpop.f32.mrf.mxu0 }
 0x46b   : > { %v1964_v2 = vmul.f32 %v1885_v57, %v1639_v62  ;;  %v1680_v26 = vpop.f32.mrf.mxu1 }
 0x46c   : > { %v1966_v4 = vmul.f32 %v1893_v58, %v1680_v26  ;;  %v1641_v5 = vpop.f32.mrf.mxu0  ;;  %v2085_v58 = vrot.slane %v1977_v53, %v3048_v24 }
 0x46d   : > { %v2128_v7 = vadd.f32 %v2049_v59, %v1964_v2  ;;  %v1965_v9 = vmul.f32 %v1889_v60, %v1641_v5  ;;  %v1682_v10 = vpop.f32.mrf.mxu1 }
 0x46e   : > { %v2130_v11 = vadd.f32 %v2057_v63, %v1966_v4  ;;  %v1967_v12 = vmul.f32 %v1897_v1, %v1682_v10  ;;  %v1643_v13 = vpop.f32.mrf.mxu0 }
 0x46f   : > { %2497 = vtanh.f32 %v2128_v7  ;;  %v2129_v20 = vadd.f32 %v2053_v3, %v1965_v9  ;;  %v1684_v14 = vpop.f32.mrf.mxu1 }
 0x470   : > { %2499 = vtanh.f32 %v2130_v11  ;;  %v2131_v15 = vadd.f32 %v2061_v6, %v1967_v12  ;;  %v1644_v16 = vpop.f32.mrf.mxu0 }
 0x471   : > { %2501 = vtanh.f32 %v2129_v20  ;;  %v1685_v17 = vpop.f32.mrf.mxu1 }
 0x472   : > { %2503 = vtanh.f32 %v2131_v15 }
 0x47c   : > { %v2498_v30 = vpop.eup %2497 }
 0x47d   : > { %v2500_v31 = vpop.eup %2499  ;;  %2180 = vst [vmem:[%s3223_s21 + $0x80] sm:$0xff] %v2498_v30 }
 0x47e   : > { %v2502_v18 = vpop.eup %2501  ;;  %2182 = vst [vmem:[%s3223_s21 + $0x90] sm:$0xff] %v2500_v31 }
 0x47f   : > { %v2504_v19 = vpop.eup %2503  ;;  %2181 = vst [vmem:[%s3223_s21 + $0x88] sm:$0xff] %v2502_v18 }
 0x480   : > { %2183 = vst [vmem:[%s3223_s21 + $0x98] sm:$0xff] %v2504_v19 }
 0x4aa   : > { %v1721_v29 = vpop.f32.mrf.mxu0 }
 0x4ab   : > { %v1968_v34 = vmul.f32 %v1901_v23, %v1721_v29  ;;  %v1762_v33 = vpop.f32.mrf.mxu1 }
 0x4ac   : > { %v1970_v36 = vmul.f32 %v1909_v25, %v1762_v33  ;;  %v1723_v38 = vpop.f32.mrf.mxu0 }
 0x4ad   : > { %v2132_v40 = vadd.f32 %v2065_v27, %v1968_v34  ;;  %v1969_v41 = vmul.f32 %v1905_v28, %v1723_v38  ;;  %v1764_v44 = vpop.f32.mrf.mxu1 }
 0x4ae   : > { %v2134_v42 = vadd.f32 %v2073_v8, %v1970_v36  ;;  %v1971_v45 = vmul.f32 %v1913_v32, %v1764_v44  ;;  %v1725_v37 = vpop.f32.mrf.mxu0 }
 0x4af   : > { %2505 = vtanh.f32 %v2132_v40  ;;  %v2133_v43 = vadd.f32 %v2069_v35, %v1969_v41  ;;  %v1766_v46 = vpop.f32.mrf.mxu1 }
 0x4b0   : > { %2507 = vtanh.f32 %v2134_v42  ;;  %v2135_v49 = vadd.f32 %v2077_v39, %v1971_v45  ;;  %v1726_v61 = vpop.f32.mrf.mxu0 }
 0x4b1   : > { %2509 = vtanh.f32 %v2133_v43  ;;  %v1767_v50 = vpop.f32.mrf.mxu1 }
 0x4b2   : > { %2511 = vtanh.f32 %v2135_v49 }
 0x4bc   : > { %v2506_v47 = vpop.eup %2505 }
 0x4bd   : > { %v2508_v48 = vpop.eup %2507  ;;  %2184 = vst [vmem:[%s3223_s21 + $0xa0] sm:$0xff] %v2506_v47 }
 0x4be   : > { %v2510_v51 = vpop.eup %2509  ;;  %2186 = vst [vmem:[%s3223_s21 + $0xb0] sm:$0xff] %v2508_v48 }
 0x4bf   : > { %v2512_v0 = vpop.eup %2511  ;;  %2185 = vst [vmem:[%s3223_s21 + $0xa8] sm:$0xff] %v2510_v51 }
 0x4c0   : > { %2187 = vst [vmem:[%s3223_s21 + $0xb8] sm:$0xff] %v2512_v0 }
 0x4ea   : > { %v1803_v21 = vpop.f32.mrf.mxu0 }
 0x4eb   : > { %v1972_v57 = vmul.f32 %v1917_v54, %v1803_v21 }
 0x4ec   : > { %v1805_v59 = vpop.f32.mrf.mxu0 }
 0x4ed   : > { %v2136_v60 = vadd.f32 %v2081_v55, %v1972_v57  ;;  %v1973_v62 = vmul.f32 %v1921_v56, %v1805_v59 }
 0x4ee   : > { %v1807_v63 = vpop.f32.mrf.mxu0 }
 0x4ef   : > { %2513 = vtanh.f32 %v2136_v60  ;;  %v2137_v1 = vadd.f32 %v2085_v58, %v1973_v62 }
 0x4f0   : > { %v1808_v2 = vpop.f32.mrf.mxu0 }
 0x4f1   : > { %2515 = vtanh.f32 %v2137_v1 }
 0x4fc   : > { %v2514_v26 = vpop.eup %2513 }
 0x4fd   : > { %2188 = vst [vmem:[%s3223_s21 + $0xc0] sm:$0xff] %v2514_v26 }
 0x4fe   : > { %v2516_v3 = vpop.eup %2515 }
 0x4ff   : > { %2189 = vst [vmem:[%s3223_s21 + $0xc8] sm:$0xff] %v2516_v3 }
 0x500 PF: > { %s3468_s30 = sld [smem:[#allocation17_spill]]  ;;  %s3471_s27 = smov %s2717_s28 }
 0x501   : > { %s3469_s26 = sld [smem:[#allocation16_spill]] }
 0x502   : > { %s3470_s29 = sld [smem:[#allocation18_spill]] }
 0x506   : > { %p23_p8 = scmp.ge.s32.totalorder %s3468_s30, 7  }
 0x507   : > { %s3472_s28 = smov %s3469_s26 }
 0x508   :  { %25 = sbr.rel (!%p23_p8) target bundleno = 9 (0x9), region = 129 }
 0x50d   :  { %2212 = vsyncpa [#allocation3], 1 }
 0x50e   :  { %2214 = vsyncpa [#allocation3 + $0x1], 1 }
 0x50f   :  { %2215 = vsyncpa [#allocation5], 1 }
 0x510   :  { %2216 = vsyncpa [#allocation8], 1 }
 0x511   :  { %2218 = vsyncpa [#allocation8 + $0x1], 1 }
 0x512   :  { %2219 = vsyncpa [#allocation11], 1 }
 0x513   :  { %2221 = vsyncpa [#allocation11 + $0x1], 1 }

</bundles_post_ra>
